<compile_context>
chip_gen: v7x
topology: tpu7x:2x2x1
jax: 0.10.0
libtpu: 0.0.40
codegen_flags: <defaults>
</compile_context>

<pallas_src>
from functools import partial

import numpy as np
import jax
import jax.numpy as jnp
from jax.experimental import pallas as pl
from jax.experimental.pallas import tpu as pltpu

LN_EPS = 1e-5   # torch.nn.LayerNorm default
LANE = 128


def _round_up(x, m):
    return ((x + m - 1) // m) * m


# -----------------------------------------------------------------------------
# exact-erf GELU (Abramowitz & Stegun 7.1.26, |erf error| <= 1.5e-7) — built only
# from ops with guaranteed Mosaic lowerings (mul/add/div/abs/where/exp).
# -----------------------------------------------------------------------------
def _gelu_erf(x):
    a1, a2, a3, a4, a5 = (0.254829592, -0.284496736, 1.421413741,
                          -1.453152027, 1.061405429)
    p = 0.3275911
    z = x * 0.7071067811865475
    s = jnp.where(z >= 0.0, 1.0, -1.0)
    az = jnp.abs(z)
    t = 1.0 / (1.0 + p * az)
    poly = ((((a5 * t + a4) * t + a3) * t + a2) * t + a1) * t
    erf = s * (1.0 - poly * jnp.exp(-az * az))
    return 0.5 * x * (1.0 + erf)


# -----------------------------------------------------------------------------
# Pallas kernel 1: fused  InceptionConv -> GELU -> InceptionConv  (one period)
# -----------------------------------------------------------------------------
def _fused_timesblock_conv_kernel(x_ref, m_ref, w1_ref, b1_ref, w2_ref, b2_ref,
                                  o_ref, xpad_ref, midpad_ref,
                                  *, H, W, K, L, LP):
    # x_ref     : (1, L, Cp)      bf16  flattened (h*W + w) activation, channels padded to 128
    # m_ref     : (K, L, 1)       f32   per-dw column validity masks
    # w1_ref    : (K*K, Cp, Fp)   bf16  fused inception weights, conv1
    # b1_ref    : (1, Fp)         f32
    # w2_ref    : (K*K, Fp, Cp)   bf16  fused inception weights, conv2
    # b2_ref    : (1, Cp)         f32
    # o_ref     : (1, L, Cp)      f32
    # xpad_ref  : (LP + L + R*W + R, Cp) f32  zero-haloed input scratch
    # midpad_ref: (LP + L + R*W + R, Fp) f32  zero-haloed GELU(conv1) scratch
    R = (K - 1) // 2

    def inception(src_ref, w_ref, b_ref):
        cout = w_ref.shape[-1]
        acc = jnp.zeros((L, cout), jnp.float32)
        for dh in range(K):
            if abs(dh - R) >= H:        # this tap only ever reads the zero halo
                continue
            row_off = (dh - R) * W
            for dw in range(K):
                if abs(dw - R) >= W:    # every column masked out
                    continue
                start = LP + row_off + (dw - R)
                xs = src_ref[start:start + L, :].astype(jnp.bfloat16)
                c = jnp.dot(xs, w_ref[dh * K + dw],
                            preferred_element_type=jnp.float32)
                if dw != R:             # zero contributions that wrapped across rows
                    c = c * m_ref[dw]
                acc = acc + c
        return acc + b_ref[...]

    # stage zero-haloed input (LP is a multiple of 8 -> aligned interior store)
    xpad_ref[...] = jnp.zeros(xpad_ref.shape, jnp.float32)
    xpad_ref[LP:LP + L, :] = x_ref[0].astype(jnp.float32)

    # inception conv #1 with exact-erf GELU fused into the epilogue
    h1 = _gelu_erf(inception(xpad_ref, w1_ref, b1_ref))

    # stage GELU output for conv #2 (stays in VMEM, no HBM round-trip)
    midpad_ref[...] = jnp.zeros(midpad_ref.shape, jnp.float32)
    midpad_ref[LP:LP + L, :] = h1

    # inception conv #2
    o_ref[0] = inception(midpad_ref, w2_ref, b2_ref).astype(o_ref.dtype)


def _column_masks(K, W, L):
    # mask[dw, i] = 1 iff output flat position i (column i % W) may read offset dw-R
    R = (K - 1) // 2
    w = np.arange(L) % W
    m = np.zeros((K, L, 1), np.float32)
    for dw in range(K):
        off = dw - R
        m[dw, :, 0] = ((w + off >= 0) & (w + off < W)).astype(np.float32)
    return jnp.asarray(m)


def timesblock_conv_pallas(x_flat, masks, w1k, b1p, w2k, b2p, *, H, W, K):
    # x_flat : (B, L, Cp) bf16 with L = H*W ; returns (B, L, Cp) f32
    B, L, Cp = x_flat.shape
    Fp = w1k.shape[-1]
    R = (K - 1) // 2
    halo = R * W + R
    LP = _round_up(halo, 8)
    NP = LP + L + halo
    kernel = partial(_fused_timesblock_conv_kernel, H=H, W=W, K=K, L=L, LP=LP)
    return pl.pallas_call(
        kernel,
        out_shape=jax.ShapeDtypeStruct((B, L, Cp), jnp.float32),
        grid=(B,),
        in_specs=[
            pl.BlockSpec((1, L, Cp), lambda b: (b, 0, 0)),
            pl.BlockSpec((K, L, 1), lambda b: (0, 0, 0)),
            pl.BlockSpec((K * K, Cp, Fp), lambda b: (0, 0, 0)),
            pl.BlockSpec((1, Fp), lambda b: (0, 0)),
            pl.BlockSpec((K * K, Fp, Cp), lambda b: (0, 0, 0)),
            pl.BlockSpec((1, Cp), lambda b: (0, 0)),
        ],
        out_specs=pl.BlockSpec((1, L, Cp), lambda b: (b, 0, 0)),
        scratch_shapes=[
            pltpu.VMEM((NP, Cp), jnp.float32),
            pltpu.VMEM((NP, Fp), jnp.float32),
        ],
        compiler_params=pltpu.CompilerParams(dimension_semantics=("parallel",)),
    )(x_flat, masks, w1k, b1p, w2k, b2p)


# -----------------------------------------------------------------------------
# Pallas kernel 2: softmax period-weights * res  ->  sum + residual + LayerNorm
# (T-tiled, channel-padded; padded lanes stay exactly zero)
# -----------------------------------------------------------------------------
def _agg_residual_layernorm_kernel(res_ref, pw_ref, x_ref, g_ref, beta_ref, o_ref,
                                   *, k, n_real, eps):
    # res_ref : (1, k, TT, Np) f32 ; pw_ref : (1, 1, k) f32 ; x_ref : (1, TT, Np) f32
    # g_ref, beta_ref : (1, Np) f32 (zero-padded affine) ; o_ref : (1, TT, Np)
    w = jax.nn.softmax(pw_ref[0].astype(jnp.float32), axis=-1)     # (1, k)
    acc = x_ref[0].astype(jnp.float32)                             # (TT, Np)
    for i in range(k):
        acc = acc + res_ref[0, i].astype(jnp.float32) * w[:, i:i + 1]

    np_ = acc.shape[-1]
    lane = jax.lax.broadcasted_iota(jnp.int32, (1, np_), 1)
    cmask = jnp.where(lane < n_real, 1.0, 0.0)                     # (1, Np)
    acc = acc * cmask                                              # keep pads exactly 0
    inv_n = 1.0 / n_real
    mean = jnp.sum(acc, axis=-1, keepdims=True) * inv_n
    cent = acc - mean
    cm = cent * cmask
    var = jnp.sum(cm * cm, axis=-1, keepdims=True) * inv_n
    normed = cent * jax.lax.rsqrt(var + eps)
    o_ref[0] = (normed * g_ref[...] + beta_ref[...]).astype(o_ref.dtype)


def _pick_t_tile(T):
    if T <= 256 or T % 8 != 0:
        return T
    for tt in (256, 128, 64, 32, 16, 8):
        if T % tt == 0:
            return tt
    return T


def agg_residual_layernorm_pallas(res, pw, x, gamma, beta, n_real):
    B, k, T, Np = res.shape
    TT = _pick_t_tile(T)
    kernel = partial(_agg_residual_layernorm_kernel, k=k, n_real=n_real, eps=LN_EPS)
    return pl.pallas_call(
        kernel,
        out_shape=jax.ShapeDtypeStruct((B, T, Np), x.dtype),
        grid=(B, T // TT),
        in_specs=[
            pl.BlockSpec((1, k, TT, Np), lambda b, t: (b, 0, t, 0)),
            pl.BlockSpec((1, 1, k), lambda b, t: (b, 0, 0)),
            pl.BlockSpec((1, TT, Np), lambda b, t: (b, t, 0)),
            pl.BlockSpec((1, Np), lambda b, t: (0, 0)),
            pl.BlockSpec((1, Np), lambda b, t: (0, 0)),
        ],
        out_specs=pl.BlockSpec((1, TT, Np), lambda b, t: (b, t, 0)),
        compiler_params=pltpu.CompilerParams(
            dimension_semantics=("parallel", "parallel")),
    )(res, pw.reshape(B, 1, k), x, gamma.reshape(1, Np), beta.reshape(1, Np))


# -----------------------------------------------------------------------------
# TimesNet glue (rfft / top-k period selection stays in JAX/NumPy)
# -----------------------------------------------------------------------------
def fft_for_period(x, k):
    # TODO(synk): torch.fft.rfft + topk has no Pallas equivalent; the PyTorch code
    # also syncs top_list to host, so each new period set retraces the pallas_calls.
    xf = jnp.fft.rfft(x, axis=1)
    amp = jnp.abs(xf)                                    # (B, F, N)
    freq = amp.mean(axis=0).mean(axis=-1)                # (F,)
    freq = freq.at[0].set(0.0)
    top_list = np.argsort(-np.asarray(jax.device_get(freq)))[:k]
    top_list = np.where(top_list == 0, 1, top_list)      # guard div-by-zero
    periods = x.shape[1] // top_list                     # host ints, like torch
    period_weight = amp.mean(axis=-1)[:, top_list]       # (B, k)
    return periods, period_weight


def prepare_layer_params(lp, ln_gamma, ln_beta, d_model, d_ffn):
    """Channel-pad to 128 lanes + cast conv weights to bf16 (kernel-ready layout)."""
    Np = _round_up(d_model, LANE)
    Fp = _round_up(d_ffn, LANE)
    K = lp["w1"].shape[0]

    def pad_w(w, ci, co, cip, cop):
        wp = jnp.zeros((K, K, cip, cop), jnp.float32).at[:, :, :ci, :co].set(w)
        return wp.reshape(K * K, cip, cop).astype(jnp.bfloat16)

    def pad_b(b, co, cop):
        return jnp.zeros((1, cop), jnp.float32).at[0, :co].set(b)

    return {
        "w1k": pad_w(lp["w1"], d_model, d_ffn, Np, Fp),
        "b1p": pad_b(lp["b1"], d_ffn, Fp),
        "w2k": pad_w(lp["w2"], d_ffn, d_model, Fp, Np),
        "b2p": pad_b(lp["b2"], d_model, Np),
        "gamma_p": jnp.zeros((Np,), jnp.float32).at[:d_model].set(ln_gamma),
        "beta_p": jnp.zeros((Np,), jnp.float32).at[:d_model].set(ln_beta),
    }


def times_block_layer_pallas(enc_p, prep, cfg):
    """One TimesBlock + shared LayerNorm, operating in channel-padded space."""
    B, T, Np = enc_p.shape
    n_real = cfg["d_model"]
    total = cfg["n_steps"] + cfg["n_pred_steps"]
    K = 2 * cfg["n_kernels"] - 1
    k = cfg["top_k"]
    periods, period_weight = fft_for_period(enc_p[:, :, :n_real], k)

    res_list = []
    for i in range(k):
        p = int(periods[i])
        if total % p != 0:
            length = ((total // p) + 1) * p
            out = jnp.concatenate(
                [enc_p, jnp.zeros((B, length - total, Np), enc_p.dtype)], axis=1)
        else:
            length = total
            out = enc_p
        H, W = length // p, p
        masks = _column_masks(K, W, length)
        # TODO(synk): periods have different (H, W) shapes, so the k periods stay
        # separate pallas_calls instead of one batched (k, B) grid.
        y = timesblock_conv_pallas(out.astype(jnp.bfloat16), masks,
                                   prep["w1k"], prep["b1p"],
                                   prep["w2k"], prep["b2p"], H=H, W=W, K=K)
        res_list.append(y[:, :total, :])

    res = jnp.stack(res_list, axis=1)                    # (B, k, T, Np)
    return agg_residual_layernorm_pallas(res, period_weight, enc_p,
                                         prep["gamma_p"], prep["beta_p"], n_real)


def backbone_timesnet_forward_pallas(X, params, cfg, layer_callback=None):
    B, T, N = X.shape
    Np = _round_up(N, LANE)
    enc = jnp.zeros((B, T, Np), X.dtype).at[:, :, :N].set(X)
    preps = [prepare_layer_params(params["layers"][l], params["ln_gamma"],
                                  params["ln_beta"], cfg["d_model"], cfg["d_ffn"])
             for l in range(cfg["n_layers"])]
    for l in range(cfg["n_layers"]):
        enc_next = times_block_layer_pallas(enc, preps[l], cfg)
        if layer_callback is not None:
            layer_callback(l, enc, enc_next)
        enc = enc_next
    return enc[:, :, :N]


# -----------------------------------------------------------------------------
# Pure-JAX references (torch semantics; optional bf16-matched rounding points)
# -----------------------------------------------------------------------------
def _conv2d_ref(x_nhwc, w_hwio, b):
    R = (w_hwio.shape[0] - 1) // 2
    y = jax.lax.conv_general_dilated(
        x_nhwc, w_hwio, window_strides=(1, 1), padding=[(R, R), (R, R)],
        dimension_numbers=("NHWC", "HWIO", "NHWC"),
        precision=jax.lax.Precision.HIGHEST)
    return y + b


def times_block_layer_ref(x, lp, gamma, beta, cfg, match_bf16):
    B, T, N = x.shape
    total = cfg["n_steps"] + cfg["n_pred_steps"]
    k = cfg["top_k"]
    periods, pw = fft_for_period(x, k)
    w1, b1, w2, b2 = lp["w1"], lp["b1"], lp["w2"], lp["b2"]
    if match_bf16:
        w1 = w1.astype(jnp.bfloat16).astype(jnp.float32)
        w2 = w2.astype(jnp.bfloat16).astype(jnp.float32)
    res_list = []
    for i in range(k):
        p = int(periods[i])
        if total % p != 0:
            length = ((total // p) + 1) * p
            out = jnp.concatenate(
                [x, jnp.zeros((B, length - total, N), x.dtype)], axis=1)
        else:
            length = total
            out = x
        out = out.reshape(B, length // p, p, N)
        if match_bf16:
            out = out.astype(jnp.bfloat16).astype(jnp.float32)
        h = jax.nn.gelu(_conv2d_ref(out, w1, b1), approximate=False)
        if match_bf16:
            h = h.astype(jnp.bfloat16).astype(jnp.float32)
        y = _conv2d_ref(h, w2, b2)
        res_list.append(y.reshape(B, length, N)[:, :total, :])
    res = jnp.stack(res_list, axis=-1)                   # (B, T, N, k)
    wsoft = jax.nn.softmax(pw, axis=-1)                  # (B, k)
    agg = jnp.einsum("btnk,bk->btn", res, wsoft) + x
    mean = agg.mean(-1, keepdims=True)
    var = ((agg - mean) ** 2).mean(-1, keepdims=True)
    return (agg - mean) * jax.lax.rsqrt(var + LN_EPS) * gamma + beta


# -----------------------------------------------------------------------------
# Deterministic parameter init (shapes follow the module __init__)
# -----------------------------------------------------------------------------
def fuse_inception_init(key, cin, cout, nk):
    # InceptionBlockV1: num_kernels parallel Conv2d(cin, cout, kernel=2i+1, pad=i),
    # outputs averaged.  Fold mean + all kernels into one (K, K, cin, cout) weight
    # (smaller kernels zero-padded to max size; conv is linear so this is exact).
    R = nk - 1
    K = 2 * R + 1
    w_eff = jnp.zeros((K, K, cin, cout), jnp.float32)
    b_eff = jnp.zeros((cout,), jnp.float32)
    for i in range(nk):
        ki = 2 * i + 1
        key, k1, k2 = jax.random.split(key, 3)
        std = float(np.sqrt(2.0 / (cout * ki * ki)))     # kaiming_normal_ fan_out / relu
        w_i = std * jax.random.normal(k1, (ki, ki, cin, cout), jnp.float32)
        b_i = 0.02 * jax.random.normal(k2, (cout,), jnp.float32)
        off = R - i
        w_eff = w_eff.at[off:off + ki, off:off + ki].add(w_i / nk)
        b_eff = b_eff + b_i / nk
    return key, w_eff, b_eff


def init_params(key, cfg):
    d_model, d_ffn, nk = cfg["d_model"], cfg["d_ffn"], cfg["n_kernels"]
    layers = []
    for _ in range(cfg["n_layers"]):
        key, w1, b1 = fuse_inception_init(key, d_model, d_ffn, nk)
        key, w2, b2 = fuse_inception_init(key, d_ffn, d_model, nk)
        layers.append({"w1": w1, "b1": b1, "w2": w2, "b2": b2})
    key, kg, kb = jax.random.split(key, 3)
    ln_gamma = 1.0 + 0.1 * jax.random.normal(kg, (d_model,), jnp.float32)
    ln_beta = 0.1 * jax.random.normal(kb, (d_model,), jnp.float32)
    return {"layers": layers, "ln_gamma": ln_gamma, "ln_beta": ln_beta}


# -----------------------------------------------------------------------------
if __name__ == "__main__":
    cfg = dict(n_layers=2, n_steps=16, n_pred_steps=0, top_k=2,
               d_model=16, d_ffn=32, n_kernels=3)
    B = 2
    T = cfg["n_steps"] + cfg["n_pred_steps"]

    key = jax.random.PRNGKey(0)
    key, kx = jax.random.split(key)
    X = jax.random.normal(kx, (B, T, cfg["d_model"]), jnp.float32)
    params = init_params(key, cfg)

    N = cfg["d_model"]

    def check_layer(layer_idx, enc_in_p, enc_out_p):
        # lock-step per-layer check: same input -> same period selection, so the
        # comparison is deterministic.
        x_in = enc_in_p[:, :, :N]
        out_p = enc_out_p[:, :, :N]
        lp = params["layers"][layer_idx]
        ref_match = times_block_layer_ref(x_in, lp, params["ln_gamma"],
                                          params["ln_beta"], cfg, match_bf16=True)
        ref_full = times_block_layer_ref(x_in, lp, params["ln_gamma"],
                                         params["ln_beta"], cfg, match_bf16=False)
        e_match = float(jnp.max(jnp.abs(out_p - ref_match)))
        e_full = float(jnp.max(jnp.abs(out_p - ref_full)))
        assert e_match < 2e-2, (
            f"layer {layer_idx}: mismatch vs bf16-matched f32 reference: {e_match}")
        assert e_full < 6e-2, (
            f"layer {layer_idx}: mismatch vs full-precision f32 reference: {e_full}")

    out = backbone_timesnet_forward_pallas(X, params, cfg, layer_callback=check_layer)
    out = jax.block_until_ready(out)

    assert out.shape == X.shape and out.dtype == X.dtype
    print("KERNEL_OK")
</pallas_src>

<mosaic_0001>
module attributes {stable_mosaic.version = 11 : i64} {
  func.func @_fused_timesblock_conv_kernel(%arg0: i32, %arg1: memref<1x16x128xbf16, #tpu.memory_space<vmem>>, %arg2: memref<5x16x1xf32, #tpu.memory_space<vmem>>, %arg3: memref<25x128x128xbf16, #tpu.memory_space<vmem>>, %arg4: memref<1x128xf32, #tpu.memory_space<vmem>>, %arg5: memref<25x128x128xbf16, #tpu.memory_space<vmem>>, %arg6: memref<1x128xf32, #tpu.memory_space<vmem>>, %arg7: memref<1x16x128xf32, #tpu.memory_space<vmem>>, %arg8: memref<90x128xf32, #tpu.memory_space<vmem>>, %arg9: memref<90x128xf32, #tpu.memory_space<vmem>>) attributes {dimension_semantics = [#tpu.dimension_semantics<parallel>], iteration_bounds = array<i64: 2>, scalar_prefetch = 0 : i64, scratch_operands = 2 : i64, tpu.core_type = #tpu.core_type<tc>, window_params = [{transform_indices = @transform_0, window_bounds = array<i64: 1, 16, 128>}, {pipeline_mode = #tpu.pipeline_mode<synchronous>, transform_indices = @transform_1, window_bounds = array<i64: 5, 16, 1>}, {pipeline_mode = #tpu.pipeline_mode<synchronous>, transform_indices = @transform_2, window_bounds = array<i64: 25, 128, 128>}, {pipeline_mode = #tpu.pipeline_mode<synchronous>, transform_indices = @transform_3, window_bounds = array<i64: 1, 128>}, {pipeline_mode = #tpu.pipeline_mode<synchronous>, transform_indices = @transform_4, window_bounds = array<i64: 25, 128, 128>}, {pipeline_mode = #tpu.pipeline_mode<synchronous>, transform_indices = @transform_5, window_bounds = array<i64: 1, 128>}, {transform_indices = @transform_6, window_bounds = array<i64: 1, 16, 128>}]} {
    %cst = arith.constant 0.000000e+00 : f32
    %0 = vector.broadcast %cst : f32 to vector<90x128xf32>
    %c0 = arith.constant 0 : index
    %c0_0 = arith.constant 0 : index
    %1 = vector.load %arg8[%c0, %c0_0] : memref<90x128xf32, #tpu.memory_space<vmem>>, vector<90x128xf32>
    tpu.vector_store %arg8[%c0, %c0_0], %0 {strides = array<i32>} : memref<90x128xf32, #tpu.memory_space<vmem>>, vector<90x128xf32>,
    %c0_1 = arith.constant 0 : index
    %c0_2 = arith.constant 0 : index
    %c0_3 = arith.constant 0 : index
    %2 = vector.load %arg1[%c0_1, %c0_2, %c0_3] : memref<1x16x128xbf16, #tpu.memory_space<vmem>>, vector<1x16x128xbf16>
    %3 = vector.shape_cast %2 : vector<1x16x128xbf16> to vector<16x128xbf16>
    %4 = arith.extf %3 : vector<16x128xbf16> to vector<16x128xf32>
    %c40 = arith.constant 40 : index
    %c0_4 = arith.constant 0 : index
    %5 = vector.load %arg8[%c40, %c0_4] : memref<90x128xf32, #tpu.memory_space<vmem>>, vector<16x128xf32>
    tpu.vector_store %arg8[%c40, %c0_4], %4 {strides = array<i32>} : memref<90x128xf32, #tpu.memory_space<vmem>>, vector<16x128xf32>,
    %cst_5 = arith.constant 0.000000e+00 : f32
    %6 = vector.broadcast %cst_5 : f32 to vector<16x128xf32>
    %c38 = arith.constant 38 : index
    %c0_6 = arith.constant 0 : index
    %7 = vector.load %arg8[%c38, %c0_6] : memref<90x128xf32, #tpu.memory_space<vmem>>, vector<16x128xf32>
    %8 = arith.truncf %7 : vector<16x128xf32> to vector<16x128xbf16>
    %c10 = arith.constant 10 : index
    %c0_7 = arith.constant 0 : index
    %c0_8 = arith.constant 0 : index
    %9 = vector.load %arg3[%c10, %c0_7, %c0_8] : memref<25x128x128xbf16, #tpu.memory_space<vmem>>, vector<1x128x128xbf16>
    %10 = vector.shape_cast %9 : vector<1x128x128xbf16> to vector<128x128xbf16>
    %cst_9 = arith.constant dense<0.000000e+00> : vector<16x128xf32>
    %11 = tpu.matmul %8, %10, %cst_9 {dimension_numbers = #tpu.dot_dimension_numbers<[1], [0], [0], [1], [0, 0, 1, 1], [], []>} : vector<16x128xbf16>, vector<128x128xbf16>, vector<16x128xf32> -> vector<16x128xf32>
    %c0_10 = arith.constant 0 : index
    %c0_11 = arith.constant 0 : index
    %c0_12 = arith.constant 0 : index
    %12 = vector.load %arg2[%c0_10, %c0_11, %c0_12] : memref<5x16x1xf32, #tpu.memory_space<vmem>>, vector<1x16x1xf32>
    %13 = vector.shape_cast %12 : vector<1x16x1xf32> to vector<16x1xf32>
    %14 = vector.broadcast %13 : vector<16x1xf32> to vector<16x128xf32>
    %15 = arith.mulf %11, %14 : vector<16x128xf32>
    %16 = arith.addf %6, %15 : vector<16x128xf32>
    %c39 = arith.constant 39 : index
    %c0_13 = arith.constant 0 : index
    %17 = vector.load %arg8[%c39, %c0_13] : memref<90x128xf32, #tpu.memory_space<vmem>>, vector<16x128xf32>
    %18 = arith.truncf %17 : vector<16x128xf32> to vector<16x128xbf16>
    %c11 = arith.constant 11 : index
    %c0_14 = arith.constant 0 : index
    %c0_15 = arith.constant 0 : index
    %19 = vector.load %arg3[%c11, %c0_14, %c0_15] : memref<25x128x128xbf16, #tpu.memory_space<vmem>>, vector<1x128x128xbf16>
    %20 = vector.shape_cast %19 : vector<1x128x128xbf16> to vector<128x128xbf16>
    %cst_16 = arith.constant dense<0.000000e+00> : vector<16x128xf32>
    %21 = tpu.matmul %18, %20, %cst_16 {dimension_numbers = #tpu.dot_dimension_numbers<[1], [0], [0], [1], [0, 0, 1, 1], [], []>} : vector<16x128xbf16>, vector<128x128xbf16>, vector<16x128xf32> -> vector<16x128xf32>
    %c1 = arith.constant 1 : index
    %c0_17 = arith.constant 0 : index
    %c0_18 = arith.constant 0 : index
    %22 = vector.load %arg2[%c1, %c0_17, %c0_18] : memref<5x16x1xf32, #tpu.memory_space<vmem>>, vector<1x16x1xf32>
    %23 = vector.shape_cast %22 : vector<1x16x1xf32> to vector<16x1xf32>
    %24 = vector.broadcast %23 : vector<16x1xf32> to vector<16x128xf32>
    %25 = arith.mulf %21, %24 : vector<16x128xf32>
    %26 = arith.addf %16, %25 : vector<16x128xf32>
    %c40_19 = arith.constant 40 : index
    %c0_20 = arith.constant 0 : index
    %27 = vector.load %arg8[%c40_19, %c0_20] : memref<90x128xf32, #tpu.memory_space<vmem>>, vector<16x128xf32>
    %28 = arith.truncf %27 : vector<16x128xf32> to vector<16x128xbf16>
    %c12 = arith.constant 12 : index
    %c0_21 = arith.constant 0 : index
    %c0_22 = arith.constant 0 : index
    %29 = vector.load %arg3[%c12, %c0_21, %c0_22] : memref<25x128x128xbf16, #tpu.memory_space<vmem>>, vector<1x128x128xbf16>
    %30 = vector.shape_cast %29 : vector<1x128x128xbf16> to vector<128x128xbf16>
    %cst_23 = arith.constant dense<0.000000e+00> : vector<16x128xf32>
    %31 = tpu.matmul %28, %30, %cst_23 {dimension_numbers = #tpu.dot_dimension_numbers<[1], [0], [0], [1], [0, 0, 1, 1], [], []>} : vector<16x128xbf16>, vector<128x128xbf16>, vector<16x128xf32> -> vector<16x128xf32>
    %32 = arith.addf %26, %31 : vector<16x128xf32>
    %c41 = arith.constant 41 : index
    %c0_24 = arith.constant 0 : index
    %33 = vector.load %arg8[%c41, %c0_24] : memref<90x128xf32, #tpu.memory_space<vmem>>, vector<16x128xf32>
    %34 = arith.truncf %33 : vector<16x128xf32> to vector<16x128xbf16>
    %c13 = arith.constant 13 : index
    %c0_25 = arith.constant 0 : index
    %c0_26 = arith.constant 0 : index
    %35 = vector.load %arg3[%c13, %c0_25, %c0_26] : memref<25x128x128xbf16, #tpu.memory_space<vmem>>, vector<1x128x128xbf16>
    %36 = vector.shape_cast %35 : vector<1x128x128xbf16> to vector<128x128xbf16>
    %cst_27 = arith.constant dense<0.000000e+00> : vector<16x128xf32>
    %37 = tpu.matmul %34, %36, %cst_27 {dimension_numbers = #tpu.dot_dimension_numbers<[1], [0], [0], [1], [0, 0, 1, 1], [], []>} : vector<16x128xbf16>, vector<128x128xbf16>, vector<16x128xf32> -> vector<16x128xf32>
    %c3 = arith.constant 3 : index
    %c0_28 = arith.constant 0 : index
    %c0_29 = arith.constant 0 : index
    %38 = vector.load %arg2[%c3, %c0_28, %c0_29] : memref<5x16x1xf32, #tpu.memory_space<vmem>>, vector<1x16x1xf32>
    %39 = vector.shape_cast %38 : vector<1x16x1xf32> to vector<16x1xf32>
    %40 = vector.broadcast %39 : vector<16x1xf32> to vector<16x128xf32>
    %41 = arith.mulf %37, %40 : vector<16x128xf32>
    %42 = arith.addf %32, %41 : vector<16x128xf32>
    %c42 = arith.constant 42 : index
    %c0_30 = arith.constant 0 : index
    %43 = vector.load %arg8[%c42, %c0_30] : memref<90x128xf32, #tpu.memory_space<vmem>>, vector<16x128xf32>
    %44 = arith.truncf %43 : vector<16x128xf32> to vector<16x128xbf16>
    %c14 = arith.constant 14 : index
    %c0_31 = arith.constant 0 : index
    %c0_32 = arith.constant 0 : index
    %45 = vector.load %arg3[%c14, %c0_31, %c0_32] : memref<25x128x128xbf16, #tpu.memory_space<vmem>>, vector<1x128x128xbf16>
    %46 = vector.shape_cast %45 : vector<1x128x128xbf16> to vector<128x128xbf16>
    %cst_33 = arith.constant dense<0.000000e+00> : vector<16x128xf32>
    %47 = tpu.matmul %44, %46, %cst_33 {dimension_numbers = #tpu.dot_dimension_numbers<[1], [0], [0], [1], [0, 0, 1, 1], [], []>} : vector<16x128xbf16>, vector<128x128xbf16>, vector<16x128xf32> -> vector<16x128xf32>
    %c4 = arith.constant 4 : index
    %c0_34 = arith.constant 0 : index
    %c0_35 = arith.constant 0 : index
    %48 = vector.load %arg2[%c4, %c0_34, %c0_35] : memref<5x16x1xf32, #tpu.memory_space<vmem>>, vector<1x16x1xf32>
    %49 = vector.shape_cast %48 : vector<1x16x1xf32> to vector<16x1xf32>
    %50 = vector.broadcast %49 : vector<16x1xf32> to vector<16x128xf32>
    %51 = arith.mulf %47, %50 : vector<16x128xf32>
    %52 = arith.addf %42, %51 : vector<16x128xf32>
    %c0_36 = arith.constant 0 : index
    %c0_37 = arith.constant 0 : index
    %53 = vector.load %arg4[%c0_36, %c0_37] : memref<1x128xf32, #tpu.memory_space<vmem>>, vector<1x128xf32>
    %54 = vector.broadcast %53 : vector<1x128xf32> to vector<16x128xf32>
    %55 = arith.addf %52, %54 : vector<16x128xf32>
    %cst_38 = arith.constant 0.707106769 : f32
    %56 = vector.broadcast %cst_38 : f32 to vector<16x128xf32>
    %57 = arith.mulf %55, %56 : vector<16x128xf32>
    %cst_39 = arith.constant 0.000000e+00 : f32
    %58 = vector.broadcast %cst_39 : f32 to vector<16x128xf32>
    %59 = arith.cmpf oge, %57, %58 : vector<16x128xf32>
    %cst_40 = arith.constant 1.000000e+00 : f32
    %cst_41 = arith.constant -1.000000e+00 : f32
    %60 = vector.broadcast %cst_40 : f32 to vector<16x128xf32>
    %61 = vector.broadcast %cst_41 : f32 to vector<16x128xf32>
    %62 = arith.select %59, %60, %61 : vector<16x128xi1>, vector<16x128xf32>
    %63 = math.absf %57 : vector<16x128xf32>
    %cst_42 = arith.constant 0.327591091 : f32
    %64 = vector.broadcast %cst_42 : f32 to vector<16x128xf32>
    %65 = arith.mulf %64, %63 : vector<16x128xf32>
    %cst_43 = arith.constant 1.000000e+00 : f32
    %66 = vector.broadcast %cst_43 : f32 to vector<16x128xf32>
    %67 = arith.addf %66, %65 : vector<16x128xf32>
    %cst_44 = arith.constant 1.000000e+00 : f32
    %68 = vector.broadcast %cst_44 : f32 to vector<16x128xf32>
    %69 = arith.divf %68, %67 : vector<16x128xf32>
    %cst_45 = arith.constant 1.06140542 : f32
    %70 = vector.broadcast %cst_45 : f32 to vector<16x128xf32>
    %71 = arith.mulf %70, %69 : vector<16x128xf32>
    %cst_46 = arith.constant -1.45315206 : f32
    %72 = vector.broadcast %cst_46 : f32 to vector<16x128xf32>
    %73 = arith.addf %71, %72 : vector<16x128xf32>
    %74 = arith.mulf %73, %69 : vector<16x128xf32>
    %cst_47 = arith.constant 1.42141378 : f32
    %75 = vector.broadcast %cst_47 : f32 to vector<16x128xf32>
    %76 = arith.addf %74, %75 : vector<16x128xf32>
    %77 = arith.mulf %76, %69 : vector<16x128xf32>
    %cst_48 = arith.constant -0.284496725 : f32
    %78 = vector.broadcast %cst_48 : f32 to vector<16x128xf32>
    %79 = arith.addf %77, %78 : vector<16x128xf32>
    %80 = arith.mulf %79, %69 : vector<16x128xf32>
    %cst_49 = arith.constant 0.254829586 : f32
    %81 = vector.broadcast %cst_49 : f32 to vector<16x128xf32>
    %82 = arith.addf %80, %81 : vector<16x128xf32>
    %83 = arith.mulf %82, %69 : vector<16x128xf32>
    %cst_50 = arith.constant 0.000000e+00 : f32
    %84 = vector.broadcast %cst_50 : f32 to vector<16x128xf32>
    %85 = arith.subf %84, %63 : vector<16x128xf32>
    %86 = arith.mulf %85, %63 : vector<16x128xf32>
    %87 = math.exp %86 : vector<16x128xf32>
    %88 = arith.mulf %83, %87 : vector<16x128xf32>
    %cst_51 = arith.constant 1.000000e+00 : f32
    %89 = vector.broadcast %cst_51 : f32 to vector<16x128xf32>
    %90 = arith.subf %89, %88 : vector<16x128xf32>
    %91 = arith.mulf %62, %90 : vector<16x128xf32>
    %cst_52 = arith.constant 5.000000e-01 : f32
    %92 = vector.broadcast %cst_52 : f32 to vector<16x128xf32>
    %93 = arith.mulf %92, %55 : vector<16x128xf32>
    %cst_53 = arith.constant 1.000000e+00 : f32
    %94 = vector.broadcast %cst_53 : f32 to vector<16x128xf32>
    %95 = arith.addf %94, %91 : vector<16x128xf32>
    %96 = arith.mulf %93, %95 : vector<16x128xf32>
    %cst_54 = arith.constant 0.000000e+00 : f32
    %97 = vector.broadcast %cst_54 : f32 to vector<90x128xf32>
    %c0_55 = arith.constant 0 : index
    %c0_56 = arith.constant 0 : index
    %98 = vector.load %arg9[%c0_55, %c0_56] : memref<90x128xf32, #tpu.memory_space<vmem>>, vector<90x128xf32>
    tpu.vector_store %arg9[%c0_55, %c0_56], %97 {strides = array<i32>} : memref<90x128xf32, #tpu.memory_space<vmem>>, vector<90x128xf32>,
    %c40_57 = arith.constant 40 : index
    %c0_58 = arith.constant 0 : index
    %99 = vector.load %arg9[%c40_57, %c0_58] : memref<90x128xf32, #tpu.memory_space<vmem>>, vector<16x128xf32>
    tpu.vector_store %arg9[%c40_57, %c0_58], %96 {strides = array<i32>} : memref<90x128xf32, #tpu.memory_space<vmem>>, vector<16x128xf32>,
    %cst_59 = arith.constant 0.000000e+00 : f32
    %100 = vector.broadcast %cst_59 : f32 to vector<16x128xf32>
    %c38_60 = arith.constant 38 : index
    %c0_61 = arith.constant 0 : index
    %101 = vector.load %arg9[%c38_60, %c0_61] : memref<90x128xf32, #tpu.memory_space<vmem>>, vector<16x128xf32>
    %102 = arith.truncf %101 : vector<16x128xf32> to vector<16x128xbf16>
    %c10_62 = arith.constant 10 : index
    %c0_63 = arith.constant 0 : index
    %c0_64 = arith.constant 0 : index
    %103 = vector.load %arg5[%c10_62, %c0_63, %c0_64] : memref<25x128x128xbf16, #tpu.memory_space<vmem>>, vector<1x128x128xbf16>
    %104 = vector.shape_cast %103 : vector<1x128x128xbf16> to vector<128x128xbf16>
    %cst_65 = arith.constant dense<0.000000e+00> : vector<16x128xf32>
    %105 = tpu.matmul %102, %104, %cst_65 {dimension_numbers = #tpu.dot_dimension_numbers<[1], [0], [0], [1], [0, 0, 1, 1], [], []>} : vector<16x128xbf16>, vector<128x128xbf16>, vector<16x128xf32> -> vector<16x128xf32>
    %c0_66 = arith.constant 0 : index
    %c0_67 = arith.constant 0 : index
    %c0_68 = arith.constant 0 : index
    %106 = vector.load %arg2[%c0_66, %c0_67, %c0_68] : memref<5x16x1xf32, #tpu.memory_space<vmem>>, vector<1x16x1xf32>
    %107 = vector.shape_cast %106 : vector<1x16x1xf32> to vector<16x1xf32>
    %108 = vector.broadcast %107 : vector<16x1xf32> to vector<16x128xf32>
    %109 = arith.mulf %105, %108 : vector<16x128xf32>
    %110 = arith.addf %100, %109 : vector<16x128xf32>
    %c39_69 = arith.constant 39 : index
    %c0_70 = arith.constant 0 : index
    %111 = vector.load %arg9[%c39_69, %c0_70] : memref<90x128xf32, #tpu.memory_space<vmem>>, vector<16x128xf32>
    %112 = arith.truncf %111 : vector<16x128xf32> to vector<16x128xbf16>
    %c11_71 = arith.constant 11 : index
    %c0_72 = arith.constant 0 : index
    %c0_73 = arith.constant 0 : index
    %113 = vector.load %arg5[%c11_71, %c0_72, %c0_73] : memref<25x128x128xbf16, #tpu.memory_space<vmem>>, vector<1x128x128xbf16>
    %114 = vector.shape_cast %113 : vector<1x128x128xbf16> to vector<128x128xbf16>
    %cst_74 = arith.constant dense<0.000000e+00> : vector<16x128xf32>
    %115 = tpu.matmul %112, %114, %cst_74 {dimension_numbers = #tpu.dot_dimension_numbers<[1], [0], [0], [1], [0, 0, 1, 1], [], []>} : vector<16x128xbf16>, vector<128x128xbf16>, vector<16x128xf32> -> vector<16x128xf32>
    %c1_75 = arith.constant 1 : index
    %c0_76 = arith.constant 0 : index
    %c0_77 = arith.constant 0 : index
    %116 = vector.load %arg2[%c1_75, %c0_76, %c0_77] : memref<5x16x1xf32, #tpu.memory_space<vmem>>, vector<1x16x1xf32>
    %117 = vector.shape_cast %116 : vector<1x16x1xf32> to vector<16x1xf32>
    %118 = vector.broadcast %117 : vector<16x1xf32> to vector<16x128xf32>
    %119 = arith.mulf %115, %118 : vector<16x128xf32>
    %120 = arith.addf %110, %119 : vector<16x128xf32>
    %c40_78 = arith.constant 40 : index
    %c0_79 = arith.constant 0 : index
    %121 = vector.load %arg9[%c40_78, %c0_79] : memref<90x128xf32, #tpu.memory_space<vmem>>, vector<16x128xf32>
    %122 = arith.truncf %121 : vector<16x128xf32> to vector<16x128xbf16>
    %c12_80 = arith.constant 12 : index
    %c0_81 = arith.constant 0 : index
    %c0_82 = arith.constant 0 : index
    %123 = vector.load %arg5[%c12_80, %c0_81, %c0_82] : memref<25x128x128xbf16, #tpu.memory_space<vmem>>, vector<1x128x128xbf16>
    %124 = vector.shape_cast %123 : vector<1x128x128xbf16> to vector<128x128xbf16>
    %cst_83 = arith.constant dense<0.000000e+00> : vector<16x128xf32>
    %125 = tpu.matmul %122, %124, %cst_83 {dimension_numbers = #tpu.dot_dimension_numbers<[1], [0], [0], [1], [0, 0, 1, 1], [], []>} : vector<16x128xbf16>, vector<128x128xbf16>, vector<16x128xf32> -> vector<16x128xf32>
    %126 = arith.addf %120, %125 : vector<16x128xf32>
    %c41_84 = arith.constant 41 : index
    %c0_85 = arith.constant 0 : index
    %127 = vector.load %arg9[%c41_84, %c0_85] : memref<90x128xf32, #tpu.memory_space<vmem>>, vector<16x128xf32>
    %128 = arith.truncf %127 : vector<16x128xf32> to vector<16x128xbf16>
    %c13_86 = arith.constant 13 : index
    %c0_87 = arith.constant 0 : index
    %c0_88 = arith.constant 0 : index
    %129 = vector.load %arg5[%c13_86, %c0_87, %c0_88] : memref<25x128x128xbf16, #tpu.memory_space<vmem>>, vector<1x128x128xbf16>
    %130 = vector.shape_cast %129 : vector<1x128x128xbf16> to vector<128x128xbf16>
    %cst_89 = arith.constant dense<0.000000e+00> : vector<16x128xf32>
    %131 = tpu.matmul %128, %130, %cst_89 {dimension_numbers = #tpu.dot_dimension_numbers<[1], [0], [0], [1], [0, 0, 1, 1], [], []>} : vector<16x128xbf16>, vector<128x128xbf16>, vector<16x128xf32> -> vector<16x128xf32>
    %c3_90 = arith.constant 3 : index
    %c0_91 = arith.constant 0 : index
    %c0_92 = arith.constant 0 : index
    %132 = vector.load %arg2[%c3_90, %c0_91, %c0_92] : memref<5x16x1xf32, #tpu.memory_space<vmem>>, vector<1x16x1xf32>
    %133 = vector.shape_cast %132 : vector<1x16x1xf32> to vector<16x1xf32>
    %134 = vector.broadcast %133 : vector<16x1xf32> to vector<16x128xf32>
    %135 = arith.mulf %131, %134 : vector<16x128xf32>
    %136 = arith.addf %126, %135 : vector<16x128xf32>
    %c42_93 = arith.constant 42 : index
    %c0_94 = arith.constant 0 : index
    %137 = vector.load %arg9[%c42_93, %c0_94] : memref<90x128xf32, #tpu.memory_space<vmem>>, vector<16x128xf32>
    %138 = arith.truncf %137 : vector<16x128xf32> to vector<16x128xbf16>
    %c14_95 = arith.constant 14 : index
    %c0_96 = arith.constant 0 : index
    %c0_97 = arith.constant 0 : index
    %139 = vector.load %arg5[%c14_95, %c0_96, %c0_97] : memref<25x128x128xbf16, #tpu.memory_space<vmem>>, vector<1x128x128xbf16>
    %140 = vector.shape_cast %139 : vector<1x128x128xbf16> to vector<128x128xbf16>
    %cst_98 = arith.constant dense<0.000000e+00> : vector<16x128xf32>
    %141 = tpu.matmul %138, %140, %cst_98 {dimension_numbers = #tpu.dot_dimension_numbers<[1], [0], [0], [1], [0, 0, 1, 1], [], []>} : vector<16x128xbf16>, vector<128x128xbf16>, vector<16x128xf32> -> vector<16x128xf32>
    %c4_99 = arith.constant 4 : index
    %c0_100 = arith.constant 0 : index
    %c0_101 = arith.constant 0 : index
    %142 = vector.load %arg2[%c4_99, %c0_100, %c0_101] : memref<5x16x1xf32, #tpu.memory_space<vmem>>, vector<1x16x1xf32>
    %143 = vector.shape_cast %142 : vector<1x16x1xf32> to vector<16x1xf32>
    %144 = vector.broadcast %143 : vector<16x1xf32> to vector<16x128xf32>
    %145 = arith.mulf %141, %144 : vector<16x128xf32>
    %146 = arith.addf %136, %145 : vector<16x128xf32>
    %c0_102 = arith.constant 0 : index
    %c0_103 = arith.constant 0 : index
    %147 = vector.load %arg6[%c0_102, %c0_103] : memref<1x128xf32, #tpu.memory_space<vmem>>, vector<1x128xf32>
    %148 = vector.broadcast %147 : vector<1x128xf32> to vector<16x128xf32>
    %149 = arith.addf %146, %148 : vector<16x128xf32>
    %c0_104 = arith.constant 0 : index
    %c0_105 = arith.constant 0 : index
    %c0_106 = arith.constant 0 : index
    %150 = vector.load %arg7[%c0_104, %c0_105, %c0_106] : memref<1x16x128xf32, #tpu.memory_space<vmem>>, vector<1x16x128xf32>
    %151 = vector.shape_cast %150 : vector<1x16x128xf32> to vector<16x128xf32>
    %152 = vector.shape_cast %149 : vector<16x128xf32> to vector<1x16x128xf32>
    tpu.vector_store %arg7[%c0_104, %c0_105, %c0_106], %152 {strides = array<i32>} : memref<1x16x128xf32, #tpu.memory_space<vmem>>, vector<1x16x128xf32>,
    return
  }
  func.func @transform_0(%arg0: i32) -> (i32, i32, i32) {
    %c0_i32 = arith.constant 0 : i32
    %c0_i32_0 = arith.constant 0 : i32
    %c0_i32_1 = arith.constant 0 : i32
    return %arg0, %c0_i32, %c0_i32_0 : i32, i32, i32
  }
  func.func @transform_1(%arg0: i32) -> (i32, i32, i32) {
    %c0_i32 = arith.constant 0 : i32
    %c0_i32_0 = arith.constant 0 : i32
    %c0_i32_1 = arith.constant 0 : i32
    %c0_i32_2 = arith.constant 0 : i32
    return %c0_i32, %c0_i32_0, %c0_i32_1 : i32, i32, i32
  }
  func.func @transform_2(%arg0: i32) -> (i32, i32, i32) {
    %c0_i32 = arith.constant 0 : i32
    %c0_i32_0 = arith.constant 0 : i32
    %c0_i32_1 = arith.constant 0 : i32
    %c0_i32_2 = arith.constant 0 : i32
    return %c0_i32, %c0_i32_0, %c0_i32_1 : i32, i32, i32
  }
  func.func @transform_3(%arg0: i32) -> (i32, i32) {
    %c0_i32 = arith.constant 0 : i32
    %c0_i32_0 = arith.constant 0 : i32
    %c0_i32_1 = arith.constant 0 : i32
    return %c0_i32, %c0_i32_0 : i32, i32
  }
  func.func @transform_4(%arg0: i32) -> (i32, i32, i32) {
    %c0_i32 = arith.constant 0 : i32
    %c0_i32_0 = arith.constant 0 : i32
    %c0_i32_1 = arith.constant 0 : i32
    %c0_i32_2 = arith.constant 0 : i32
    return %c0_i32, %c0_i32_0, %c0_i32_1 : i32, i32, i32
  }
  func.func @transform_5(%arg0: i32) -> (i32, i32) {
    %c0_i32 = arith.constant 0 : i32
    %c0_i32_0 = arith.constant 0 : i32
    %c0_i32_1 = arith.constant 0 : i32
    return %c0_i32, %c0_i32_0 : i32, i32
  }
  func.func @transform_6(%arg0: i32) -> (i32, i32, i32) {
    %c0_i32 = arith.constant 0 : i32
    %c0_i32_0 = arith.constant 0 : i32
    %c0_i32_1 = arith.constant 0 : i32
    return %arg0, %c0_i32, %c0_i32_0 : i32, i32, i32
  }
}

</mosaic_0001>

<bundles_post_ra>
// kernel: tpu_custom_call.1
= control target key start
LH: loop header
LB: loop body
LE: loop exit
PB: predicated region body
PF: predicated region fallthrough
CT: control target
= control target key end

     0   :  { %11 = vsyncpa [#allocation5], 0  ;;  %s2774_s0 = inlined_call_operand.vmem [shape: bf16[2,16,128], index: 0, kind: input, shape index: {}]   ;;  %s2775_s1 = inlined_call_operand.vmem [shape: f32[5,16,1], index: 1, kind: input, shape index: {}]   ;;  %s2776_s2 = inlined_call_operand.hbm [shape: bf16[25,128,128], index: 2, kind: input, shape index: {}]   ;;  %s2777_s3 = inlined_call_operand.vmem [shape: f32[1,128], index: 3, kind: input, shape index: {}]   ;;  %s2778_s4 = inlined_call_operand.hbm [shape: bf16[25,128,128], index: 4, kind: input, shape index: {}]   ;;  %s2779_s5 = inlined_call_operand.vmem [shape: f32[1,128], index: 5, kind: input, shape index: {}]   ;;  %s2780_s6 = inlined_call_operand.hbm [shape: f32[2,16,128], index: 6, kind: output, shape index: {}]  }
   0x1   :  { %12 = vsyncpa [#allocation8], 0 }
   0x2   :  { %13 = vsyncpa [#allocation6], 0 }
   0x3   :  { %15 = vsyncpa [#allocation6 + $0x1], 0  ;;  %s2450_s21 = smov 0   ;;  %s2452_s22 = smov 0  }
   0x4   :  { %s2454_s23 = smov 0   ;;  %s2456_s24 = smov 0  }
   0x5 LB: > { %s2471_s25 = sadd.s32 4294967295, %s2402_s24   ;;  %s1710_s26 = sadd.s32 4294967294, %s2402_s24   ;;  %s2402_s24 = sphi %s2456_s24, %s2798_s24   ;;  %s2398_s23 = sphi %s2454_s23, %s2797_s23   ;;  %s2394_s22 = sphi %s2452_s22, %s2796_s22   ;;  %s2390_s21 = sphi %s2450_s21, %s2795_s21  }
   0x6   : > { %s2475_s27 = sadd.s32 1, %s2402_s24   ;;  %s159_s28 = sadd.s32 1, %s2398_s23 }
   0x7   : > { %s156_s29 = ssub.s32 %s2402_s24, %s2475_s27  ;;  %p169_p0 = scmp.ne.s32.totalorder %s2398_s23, %s2394_s22 }
   0x8   : > { %p157_p1 = scmp.eq.s32.totalorder %s156_s29, 0  ;;  %p170_p2 = scmp.eq.s32.totalorder %s2471_s25, 1 }
   0x9   : > { %p175_p3 = scmp.ne.s32.totalorder %s2394_s22, %s2390_s21  ;;  %p176_p4 = scmp.eq.s32.totalorder %s1710_s26, 1 }
   0xa   : > { %s2486_s30 = scalar_select %p157_p1, %s2398_s23, %s159_s28  }
   0xb   : > { %p2488_p5 = por %p170_p2, %p169_p0  ;;  %p2492_p6 = por %p176_p4, %p175_p3 }
   0xc   : > { %p1711_p7 = scmp.ge.s32.totalorder %s2402_s24, 1  ;;  %p183_p8 = scmp.lt.s32.totalorder %s2402_s24, 3 }
   0xd   : > { %s2784_s7 = scalar_select %p2488_p5, 1, 0 }
   0xe   : > { %s2785_s8 = scalar_select %p2492_p6, 1, 0 }
   0xf   : > { %p2781_p9 = scmp.eq.s32.totalorder %s2471_s25, 0  ;;  %p2499_p10 = pnand %p1711_p7, %p183_p8 }
  0x10   : > { %s2404_s10 = smov [#allocation4]   ;;  %s2405_s13 = smov [#allocation7]  }
  0x11   : > { %s2786_s9 = scalar_select %p2499_p10, 1, 0 }
  0x12   : > { %s198_s11 = sshll.u32 %s2404_s10, 4  ;;  %p2126_p11 = pneg %p2499_p10  ;;  %s199_s11 = int_to_ptr.vmem [resolvable:$true] %s198_s11 }
  0x13   : > { %s214_s14 = sshll.u32 %s2405_s13, 4  ;;  %s2276_s17 = scalar_lea.hbm %s2776_s2, 25600  ;;  %s2511_s14 = int_to_ptr.vmem [resolvable:$true] %s214_s14 }
  0x14   : > { %p2507_p12 = pnand %p2781_p9, %p2126_p11  ;;  %p2277_p13 = scmp.ne.s32.totalorder %s2776_s2, %s2276_s17 }
  0x15   : > { %p2283_p3 = scmp.lt.u32.totalorder %s2276_s17, %s2776_s2 }
  0x16   : > { %p2278_p0 = pneg %p2507_p12 }
  0x18   : > { %p2279_p1 = pnand %p2278_p0, %p2277_p13 }
  0x1a   : > { %p2280_p2 = pneg %p2279_p1 }
  0x1c   : > { %p2285_p4 = pnand %p2283_p3, %p2280_p2 }
  0x1e   : > { %2288 = shalt.err (!%p2285_p4)
}
  0x1f   : > { %s2289_s28 = scalar_lea.vmem %s199_s11, 25600  ;;  %p2297_p9 = scmp.lt.s32.totalorder %s199_s11, %s199_s11 }
  0x20   : > { %p2290_p7 = scmp.ne.s32.totalorder %s199_s11, %s2289_s28  ;;  %p2298_p6 = scmp.lt.s32.totalorder %s2289_s28, %s2289_s28 }
  0x22   : > { %p2292_p8 = pnand %p2290_p7, %p2278_p0  ;;  %p2299_p5 = por %p2298_p6, %p2297_p9 }
  0x24   : > { %p2293_p11 = pneg %p2292_p8 }
  0x26   : > { %p2300_p10 = pnand %p2299_p5, %p2293_p11 }
  0x28   : > { %2303 = shalt.err (!%p2300_p10)
}
  0x29   : > { %s2406_s29 = smov 64   ;;  %s2407_s10 = smov 4  }
  0x2a   : > { %2129 = dma.hbm_to_vmem [thread:$0]  (!%p2507_p12), %s2776_s2, 25600, %s199_s11, [#allocation5], %s2406_s29, %s2406_s29, %s2407_s10  }
  0x2b   : > { %s2304_s18 = scalar_lea.hbm %s2778_s4, 25600 }
  0x2c   : > { %p2305_p13 = scmp.ne.s32.totalorder %s2778_s4, %s2304_s18  ;;  %p2311_p9 = scmp.lt.u32.totalorder %s2304_s18, %s2778_s4 }
  0x2e   : > { %p2307_p5 = pnand %p2305_p13, %p2278_p0 }
  0x30   : > { %p2308_p6 = pneg %p2307_p5 }
  0x32   : > { %p2313_p10 = pnand %p2311_p9, %p2308_p6 }
  0x34   : > { %2316 = shalt.err (!%p2313_p10)
}
  0x35   : > { %s2317_s11 = scalar_lea.vmem %s2511_s14, 25600  ;;  %p2325_p4 = scmp.lt.s32.totalorder %s2511_s14, %s2511_s14 }
  0x36   : > { %p2318_p1 = scmp.ne.s32.totalorder %s2511_s14, %s2317_s11  ;;  %p2326_p7 = scmp.lt.s32.totalorder %s2317_s11, %s2317_s11 }
  0x38   : > { %p2320_p2 = pnand %p2318_p1, %p2278_p0  ;;  %p2327_p8 = por %p2326_p7, %p2325_p4 }
  0x3a   : > { %p2321_p3 = pneg %p2320_p2 }
  0x3c   : > { %p2328_p11 = pnand %p2327_p8, %p2321_p3 }
  0x3e   : > { %2331 = shalt.err (!%p2328_p11)
}
  0x3f   : > { %2132 = dma.hbm_to_vmem [thread:$0]  (!%p2507_p12), %s2778_s4, 25600, %s2511_s14, [#allocation8], %s2406_s29, %s2406_s29, %s2407_s10  }
  0x40   : > { %p2788_p13 = scmp.ne.s32.totalorder %s2786_s9, 0 }
  0x41   : > { %p2789_p5 = scmp.eq.s32.totalorder (!%p2788_p13), %s2471_s25, 0 }
  0x42   : > { %241 = sbr.rel (%p2788_p13) target bundleno = 753 (0x2f1), region = 44 }
  0x49   : > { %2377 = dma.done.wait (%p2789_p5), [#allocation5], 25600   ;;  %p2790_p0 = pmov %p2789_p5 }
  0x4b   : > { %2379 = vsyncadd (%p2790_p0), [#allocation5], 4294941696  ;;  %p2791_p6 = pmov %p2790_p0 }
  0x4c   : > { %p2792_p9 = pmov %p2790_p0 }
  0x4d   : > { %2381 = dma.done.wait (%p2791_p6), [#allocation8], 25600  }
  0x4e   : > { %2383 = vsyncadd (%p2792_p9), [#allocation8], 4294941696  ;;  %v2408_v0 = vmov 0.0   ;;  %vm2409_vm0 = vmmov 0   ;;  %v2410_v1 = vmov 0   ;;  %v2186_v2 = vld [vmem:[#allocation4 + $0x280] sm:$0xff]  }
  0x4f   : > { %281 = vst [vmem:[#allocation2] sm:$0xff] %v2408_v0  ;;  %285 = vst [vmem:[#allocation2 + $0x20] sm:$0xff] %v2408_v0  ;;  %1916 = vmatprep.subr.bf16.mxu0 %v2408_v0  ;;  %1936 = vmatprep.subr.bf16.mxu1 %v2408_v0  ;;  %v2187_v3 = vld [vmem:[#allocation4 + $0x2c0] sm:$0xff]   ;;  %v2188_v4 = vld [vmem:[#allocation4 + $0x288] sm:$0xff]   ;;  %p275_p12 = scmp.lt.s32.totalorder %s2471_s25, 1  ;;  %s272_s19 = sand.u32 1, %s2394_s22  }
  0x50   : > { %288 = vst [vmem:[#allocation2 + $0x38] sm:$0xff] %v2408_v0  ;;  %980 = vst [vmem:[#allocation3 + $0x20] sm:$0xff] %v2408_v0  ;;  %1932 = vmatprep.mubr.msk.bf16.mxu0 %vm2409_vm0, %v2408_v0  ;;  %1952 = vmatprep.mubr.msk.bf16.mxu1 %vm2409_vm0, %v2408_v0  ;;  %v2189_v5 = vld [vmem:[#allocation4 + $0x2c8] sm:$0xff]   ;;  %v2190_v6 = vld [vmem:[#allocation4 + $0x290] sm:$0xff]   ;;  %s1718_s20 = sshll.u32 %s272_s19, 4  ;;  %s1821_s15 = sshll.u32 %s2471_s25, 8 }
  0x51   : > { %983 = vst [vmem:[#allocation3 + $0x38] sm:$0xff] %v2408_v0  ;;  %2185 = vset.pattern.permute.xlu1 %v2410_v1  ;;  %2184 = vset.pattern.permute.xlu0 %v2410_v1  ;;  %s276_s9 = scalar_select %p275_p12, %s2471_s25, 1  ;;  %v2191_v7 = vld [vmem:[#allocation4 + $0x2d0] sm:$0xff]   ;;  %v2192_v8 = vld [vmem:[#allocation4 + $0x298] sm:$0xff]   ;;  %v2194_v10 = vld [vmem:[#allocation4 + $0x2a0] sm:$0xff]  }
  0x52   : > { %1917 = vmatpush3.bf16.msra.mxu0 %v2186_v2  ;;  %1937 = vmatpush3.bf16.msra.mxu1 %v2187_v3  ;;  %v2193_v9 = vld [vmem:[#allocation4 + $0x2d8] sm:$0xff]   ;;  %v2195_v11 = vld [vmem:[#allocation4 + $0x2e0] sm:$0xff]   ;;  %v2196_v15 = vld [vmem:[#allocation4 + $0x2a8] sm:$0xff]   ;;  %s274_s11 = scalar_lea.vmem [#allocation9], %s1718_s20  ;;  %s2731_s14 = scalar_lea.hbm %s2780_s6, %s1821_s15 }
  0x53   : > { %1918 = vmatprep.subr.bf16.mxu0 %v2408_v0  ;;  %1938 = vmatprep.subr.bf16.mxu1 %v2408_v0  ;;  %s1820_s12 = sshll.u32 %s276_s9, 3  ;;  %v2197_v16 = vld [vmem:[#allocation4 + $0x2e8] sm:$0xff]   ;;  %v2198_v17 = vld [vmem:[#allocation4 + $0x2b0] sm:$0xff]   ;;  %v2200_v19 = vld [vmem:[#allocation4 + $0x2b8] sm:$0xff]   ;;  %s1626_s13 = sshll.u32 %s274_s11, 4  ;;  %s2726_s13 = int_to_ptr.vmem [resolvable:$true] %s1626_s13 }
  0x54   : > { %s2592_s10 = scalar_lea.vmem %s2774_s0, %s1820_s12  ;;  %v2199_v18 = vld [vmem:[#allocation4 + $0x2f0] sm:$0xff]   ;;  %v2201_v20 = vld [vmem:[#allocation4 + $0x2f8] sm:$0xff]   ;;  %v2202_v27 = vld [vmem:[#allocation4 + $0x300] sm:$0xff]   ;;  %s2733_s29 = scalar_lea.sflag [#allocation6], %s272_s19 }
  0x55   : > { %v1823_v12 = vld [vmem:[%s2592_s10] sm:$0xff]   ;;  %v2204_v29 = vld [vmem:[#allocation4 + $0x308] sm:$0xff]   ;;  %v2206_v31 = vld [vmem:[#allocation4 + $0x310] sm:$0xff]   ;;  %s2332_s16 = scalar_lea.vmem %s2726_s13, 256  ;;  %p2793_p1 = scmp.ne.s32.totalorder %s2784_s7, 0 }
  0x56   : > { %1919 = vmatpush3.bf16.msra.mxu0 %v2188_v4  ;;  %1939 = vmatpush3.bf16.msra.mxu1 %v2189_v5  ;;  %v1824_v13 = vunpack.c.l.bf16 %v1823_v12  ;;  %v1825_v14 = vunpack.c.h.bf16 %v1823_v12  ;;  %v2203_v28 = vld [vmem:[#allocation4 + $0x340] sm:$0xff]   ;;  %v2205_v30 = vld [vmem:[#allocation4 + $0x348] sm:$0xff]   ;;  %v2207_v32 = vld [vmem:[#allocation4 + $0x350] sm:$0xff]   ;;  %p2333_p10 = scmp.ne.s32.totalorder %s2726_s13, %s2332_s16  ;;  %s2412_s25 = smov [#allocation9]  }
  0x57   : > { %1920 = vmatprep.subr.bf16.mxu0 %v2408_v0  ;;  %1940 = vmatprep.subr.bf16.mxu1 %v2408_v0  ;;  %v2208_v33 = vld [vmem:[#allocation4 + $0x318] sm:$0xff]   ;;  %v1737_v35 = vld [vmem:[%s2775_s1 + $0x10] sm:$0xff]  ;;  %v408_v36 = vld [vmem:[%s2775_s1] sm:$0xff]  ;;  %s2336_s17 = sshll.u32 %s2412_s25, 4  ;;  %s2337_s17 = int_to_ptr.vmem [resolvable:$false] %s2336_s17 }
  0x58   : > { %297 = vst [vmem:[#allocation2 + $0x28] sm:$0xff] %v1824_v13  ;;  %298 = vst [vmem:[#allocation2 + $0x30] sm:$0xff] %v1825_v14  ;;  %v2209_v34 = vld [vmem:[#allocation4 + $0x358] sm:$0xff]   ;;  %v2210_v37 = vld [vmem:[#allocation4 + $0x320] sm:$0xff]   ;;  %538 = vperm.xlu1 %2185, %v1737_v35   ;;  %412 = vperm.xlu0 %2184, %v408_v36   ;;  %p2334_p2 = pnand %p2333_p10, %p2793_p1  ;;  %p2339_p4 = scmp.lt.s32.totalorder %s2726_s13, %s2337_s17 }
  0x59   : > { %v2211_v38 = vld [vmem:[#allocation4 + $0x360] sm:$0xff]   ;;  %v1738_v39 = vld [vmem:[%s2775_s1 + $0x18] sm:$0xff]  ;;  %v409_v40 = vld [vmem:[%s2775_s1 + $0x8] sm:$0xff] }
  0x5a   : > { %1921 = vmatpush3.bf16.msra.mxu0 %v2190_v6  ;;  %1941 = vmatpush3.bf16.msra.mxu1 %v2191_v7  ;;  %v1756_v41 = vld [vmem:[%s2775_s1 + $0x38] sm:$0xff]  ;;  %v2212_v42 = vld [vmem:[#allocation4 + $0x328] sm:$0xff]   ;;  %v1755_v43 = vld [vmem:[%s2775_s1 + $0x30] sm:$0xff]  ;;  %p2335_p3 = pneg %p2334_p2 }
  0x5b   : > { %1922 = vmatprep.subr.bf16.mxu0 %v2408_v0  ;;  %1942 = vmatprep.subr.bf16.mxu1 %v2408_v0  ;;  %v2213_v44 = vld [vmem:[#allocation4 + $0x368] sm:$0xff]   ;;  %v2214_v46 = vld [vmem:[#allocation4 + $0x330] sm:$0xff]   ;;  %v1765_v47 = vld [vmem:[%s2775_s1 + $0x40] sm:$0xff] }
  0x5c   : > { %543 = vperm.xlu1 %2185, %v1738_v39   ;;  %417 = vperm.xlu0 %2184, %v409_v40   ;;  %v1766_v45 = vld [vmem:[%s2775_s1 + $0x48] sm:$0xff]  ;;  %v2215_v48 = vld [vmem:[#allocation4 + $0x370] sm:$0xff]   ;;  %v2216_v49 = vld [vmem:[#allocation4 + $0x338] sm:$0xff]  }
  0x5d   : > { %v2217_v50 = vld [vmem:[#allocation4 + $0x378] sm:$0xff]   ;;  %v2218_v53 = vld [vmem:[%s2592_s10] sm:$0xff]  ;;  %v2220_v56 = vld [vmem:[#allocation4 + $0x388] sm:$0xff]   ;;  %s2338_s10 = scalar_lea.vmem %s2337_s17, 512 }
  0x5e   : > { %1923 = vmatpush3.bf16.msra.mxu0 %v2192_v8  ;;  %1943 = vmatpush3.bf16.msra.mxu1 %v2193_v9  ;;  %v2219_v54 = vld [vmem:[#allocation4 + $0x380] sm:$0xff]   ;;  %v2221_v57 = vld [vmem:[#allocation4 + $0x390] sm:$0xff]   ;;  %v2222_v58 = vld [vmem:[#allocation4 + $0x398] sm:$0xff]   ;;  %p2340_p7 = scmp.lt.s32.totalorder %s2338_s10, %s2332_s16 }
  0x5f   : > { %1924 = vmatprep.subr.bf16.mxu0 %v2408_v0  ;;  %1944 = vmatprep.subr.bf16.mxu1 %v2408_v0  ;;  %v299_v21 = vld [vmem:[#allocation2 + $0x26] sm:$0xff]  ;;  %v300_v22 = vld [vmem:[#allocation2 + $0x2e] sm:$0xff]  ;;  %v2226_v62 = vld [vmem:[#allocation4 + $0x3b8] sm:$0xff]  }
  0x60   : > { %v424_v23 = vld [vmem:[#allocation2 + $0x27] sm:$0xff]  ;;  %v425_v24 = vld [vmem:[#allocation2 + $0x2f] sm:$0xff]  ;;  %v301_v25 = vpack.c.bf16 %v300_v22, %v299_v21  ;;  %780 = vperm.xlu1 %2185, %v1756_v41   ;;  %775 = vperm.xlu0 %2184, %v1755_v43   ;;  %v2233_v9 = vld [vmem:[#allocation7 + $0x298] sm:$0xff]   ;;  %p2341_p8 = por %p2340_p7, %p2339_p4 }
  0x61   : > { %v426_v26 = vpack.c.bf16 %v425_v24, %v424_v23  ;;  %v661_v51 = vld [vmem:[#allocation2 + $0x29] sm:$0xff]  ;;  %v662_v52 = vld [vmem:[#allocation2 + $0x31] sm:$0xff]  ;;  %v2223_v59 = vld [vmem:[#allocation4 + $0x3a0] sm:$0xff]  }
  0x62   : > { %1925 = vmatpush3.bf16.msra.mxu0 %v2194_v10  ;;  %1945 = vmatpush3.bf16.msra.mxu1 %v2195_v11  ;;  %v663_v55 = vpack.c.bf16 %v662_v52, %v661_v51  ;;  %v2224_v60 = vld [vmem:[#allocation4 + $0x3a8] sm:$0xff]   ;;  %v2225_v61 = vld [vmem:[#allocation4 + $0x3b0] sm:$0xff]   ;;  %v2227_v3 = vld [vmem:[#allocation7 + $0x280] sm:$0xff]   ;;  %p2342_p11 = pnand %p2341_p8, %p2335_p3 }
  0x63   : > { %1926 = vmatprep.subr.bf16.mxu0 %v2408_v0  ;;  %1946 = vmatprep.subr.bf16.mxu1 %v2408_v0  ;;  %v787_v63 = vld [vmem:[#allocation2 + $0x2a] sm:$0xff]  ;;  %v788_v1 = vld [vmem:[#allocation2 + $0x32] sm:$0xff]  ;;  %v2228_v4 = vld [vmem:[#allocation7 + $0x2c0] sm:$0xff]  }
  0x64   : > { %906 = vperm.xlu1 %2185, %v1766_v45   ;;  %901 = vperm.xlu0 %2184, %v1765_v47   ;;  %v789_v2 = vpack.c.bf16 %v788_v1, %v787_v63  ;;  %v2229_v5 = vld [vmem:[#allocation7 + $0x288] sm:$0xff]   ;;  %v2231_v7 = vld [vmem:[#allocation7 + $0x290] sm:$0xff]   ;;  %v2234_v10 = vld [vmem:[#allocation7 + $0x2d8] sm:$0xff]  }
  0x65   : > { %v2230_v6 = vld [vmem:[#allocation7 + $0x2c8] sm:$0xff]   ;;  %v2232_v8 = vld [vmem:[#allocation7 + $0x2d0] sm:$0xff]   ;;  %v2235_v11 = vld [vmem:[#allocation7 + $0x2a0] sm:$0xff]  }
  0x66   : > { %1927 = vmatpush3.bf16.msra.mxu0 %v2196_v15  ;;  %1947 = vmatpush3.bf16.msra.mxu1 %v2197_v16  ;;  %v2236_v12 = vld [vmem:[#allocation7 + $0x2e0] sm:$0xff]   ;;  %v2237_v13 = vld [vmem:[#allocation7 + $0x2a8] sm:$0xff]   ;;  %v2239_v16 = vld [vmem:[#allocation7 + $0x2b0] sm:$0xff]  }
  0x67   : > { %1928 = vmatprep.subr.bf16.mxu0 %v2408_v0  ;;  %1948 = vmatprep.subr.bf16.mxu1 %v2408_v0  ;;  %v2238_v14 = vld [vmem:[#allocation7 + $0x2e8] sm:$0xff]  }
  0x68   : > { %1108 = vperm.xlu1 %2185, %v409_v40   ;;  %1103 = vperm.xlu0 %2184, %v408_v36  }
  0x6a   : > { %1929 = vmatpush3.bf16.msra.mxu0 %v2198_v17  ;;  %1949 = vmatpush3.bf16.msra.mxu1 %v2199_v18  ;;  %v2240_v17 = vld [vmem:[#allocation7 + $0x2f0] sm:$0xff]  }
  0x6b   : > { %1930 = vmatprep.subr.bf16.mxu0 %v2408_v0  ;;  %1950 = vmatprep.subr.bf16.mxu1 %v2408_v0 }
  0x6c   : > { %1233 = vperm.xlu1 %2185, %v1738_v39   ;;  %1228 = vperm.xlu0 %2184, %v1737_v35  }
  0x6e   : > { %1931 = vmatpush3.bf16.msra.mxu0 %v2200_v19  ;;  %1951 = vmatpush3.bf16.msra.mxu1 %v2201_v20  ;;  %v2241_v19 = vld [vmem:[#allocation7 + $0x2b8] sm:$0xff]  }
  0x6f   : > { %1956 = vmatprep.subr.bf16.mxu0 %v2408_v0  ;;  %1976 = vmatprep.subr.bf16.mxu1 %v2408_v0  ;;  %v2242_v20 = vld [vmem:[#allocation7 + $0x2f8] sm:$0xff]  }
  0x70   : > { %1469 = vperm.xlu1 %2185, %v1756_v41   ;;  %1464 = vperm.xlu0 %2184, %v1755_v43  }
  0x71   : > { %1933 = vmatmul.mubr.bf16.vlgmr.msra.gmra.mrb[0].mxu0 %v301_v25  ;;  %1953 = vmatmul.mubr.bf16.vlgmr.msra.gmra.mrb[0].mxu1 %v426_v26 }
  0x72   : > { %1957 = vmatpush3.bf16.msra.mxu0 %v2202_v27  ;;  %1977 = vmatpush3.bf16.msra.mxu1 %v2203_v28 }
  0x73   : > { %1958 = vmatprep.subr.bf16.mxu0 %v2408_v0  ;;  %1978 = vmatprep.subr.bf16.mxu1 %v2408_v0 }
  0x74   : > { %1972 = vmatprep.mubr.msk.bf16.mxu0 %vm2409_vm0, %v2408_v0  ;;  %1992 = vmatprep.mubr.msk.bf16.mxu1 %vm2409_vm0, %v2408_v0 }
  0x75   : > { %1594 = vperm.xlu1 %2185, %v1766_v45   ;;  %1589 = vperm.xlu0 %2184, %v1765_v47  }
  0x76   : > { %1959 = vmatpush3.bf16.msra.mxu0 %v2204_v29  ;;  %1979 = vmatpush3.bf16.msra.mxu1 %v2205_v30 }
  0x77   : > { %1960 = vmatprep.subr.bf16.mxu0 %v2408_v0  ;;  %1980 = vmatprep.subr.bf16.mxu1 %v2408_v0 }
  0x7a   : > { %1961 = vmatpush3.bf16.msra.mxu0 %v2206_v31  ;;  %1981 = vmatpush3.bf16.msra.mxu1 %v2207_v32 }
  0x7b   : > { %1962 = vmatprep.subr.bf16.mxu0 %v2408_v0  ;;  %1982 = vmatprep.subr.bf16.mxu1 %v2408_v0 }
  0x7e   : > { %1963 = vmatpush3.bf16.msra.mxu0 %v2208_v33  ;;  %1983 = vmatpush3.bf16.msra.mxu1 %v2209_v34 }
  0x7f   : > { %1964 = vmatprep.subr.bf16.mxu0 %v2408_v0  ;;  %1984 = vmatprep.subr.bf16.mxu1 %v2408_v0 }
  0x82   : > { %1965 = vmatpush3.bf16.msra.mxu0 %v2210_v37  ;;  %1985 = vmatpush3.bf16.msra.mxu1 %v2211_v38 }
  0x83   : > { %1966 = vmatprep.subr.bf16.mxu0 %v2408_v0  ;;  %1986 = vmatprep.subr.bf16.mxu1 %v2408_v0 }
  0x86   : > { %1967 = vmatpush3.bf16.msra.mxu0 %v2212_v42  ;;  %1987 = vmatpush3.bf16.msra.mxu1 %v2213_v44 }
  0x87   : > { %1968 = vmatprep.subr.bf16.mxu0 %v2408_v0  ;;  %1988 = vmatprep.subr.bf16.mxu1 %v2408_v0 }
  0x8a   : > { %1969 = vmatpush3.bf16.msra.mxu0 %v2214_v46  ;;  %1989 = vmatpush3.bf16.msra.mxu1 %v2215_v48 }
  0x8b   : > { %1970 = vmatprep.subr.bf16.mxu0 %v2408_v0  ;;  %1990 = vmatprep.subr.bf16.mxu1 %v2408_v0 }
  0x8e   : > { %1971 = vmatpush3.bf16.msra.mxu0 %v2216_v49  ;;  %1991 = vmatpush3.bf16.msra.mxu1 %v2217_v50 }
  0x8f   : > { %1996 = vmatprep.subr.bf16.mxu0 %v2408_v0  ;;  %2016 = vmatprep.subr.bf16.mxu1 %v2408_v0 }
  0x91   : > { %1973 = vmatmul.mubr.bf16.vlgmr.msra.gmra.mrb[4].mxu0 %v2218_v53  ;;  %1993 = vmatmul.mubr.bf16.vlgmr.msra.gmra.mrb[4].mxu1 %v663_v55 }
  0x92   : > { %1997 = vmatpush3.bf16.msra.mxu0 %v2219_v54  ;;  %2012 = vmatprep.mubr.msk.bf16.mxu0 %vm2409_vm0, %v2408_v0 }
  0x93   : > { %1998 = vmatprep.subr.bf16.mxu0 %v2408_v0  ;;  %2032 = vmatprep.mubr.msk.bf16.mxu1 %vm2409_vm0, %v2408_v0 }
  0x94   : > { %2017 = vmatpush3.bf16.msra.mxu1 %v2227_v3 }
  0x95   : > { %2018 = vmatprep.subr.bf16.mxu1 %v2408_v0 }
  0x96   : > { %1999 = vmatpush3.bf16.msra.mxu0 %v2220_v56 }
  0x97   : > { %2000 = vmatprep.subr.bf16.mxu0 %v2408_v0 }
  0x98   : > { %2019 = vmatpush3.bf16.msra.mxu1 %v2229_v5 }
  0x99   : > { %2020 = vmatprep.subr.bf16.mxu1 %v2408_v0 }
  0x9a   : > { %2001 = vmatpush3.bf16.msra.mxu0 %v2221_v57  ;;  %v1767_v57 = vld [vmem:[%s2777_s3] ss:$0 sm:$0xff] }
  0x9b   : > { %2002 = vmatprep.subr.bf16.mxu0 %v2408_v0 }
  0x9c   : > { %2021 = vmatpush3.bf16.msra.mxu1 %v2231_v7 }
  0x9d   : > { %2022 = vmatprep.subr.bf16.mxu1 %v2408_v0 }
  0x9e   : > { %2003 = vmatpush3.bf16.msra.mxu0 %v2222_v58 }
  0x9f   : > { %2004 = vmatprep.subr.bf16.mxu0 %v2408_v0 }
  0xa0   : > { %2023 = vmatpush3.bf16.msra.mxu1 %v2233_v9 }
  0xa1   : > { %2024 = vmatprep.subr.bf16.mxu1 %v2408_v0 }
  0xa2   : > { %2005 = vmatpush3.bf16.msra.mxu0 %v2223_v59 }
  0xa3   : > { %2006 = vmatprep.subr.bf16.mxu0 %v2408_v0 }
  0xa4   : > { %2025 = vmatpush3.bf16.msra.mxu1 %v2235_v11 }
  0xa5   : > { %2026 = vmatprep.subr.bf16.mxu1 %v2408_v0 }
  0xa6   : > { %2007 = vmatpush3.bf16.msra.mxu0 %v2224_v60 }
  0xa7   : > { %2008 = vmatprep.subr.bf16.mxu0 %v2408_v0 }
  0xa8   : > { %2027 = vmatpush3.bf16.msra.mxu1 %v2237_v13 }
  0xa9   : > { %2028 = vmatprep.subr.bf16.mxu1 %v2408_v0 }
  0xaa   : > { %2009 = vmatpush3.bf16.msra.mxu0 %v2225_v61 }
  0xab   : > { %2010 = vmatprep.subr.bf16.mxu0 %v2408_v0 }
  0xac   : > { %2029 = vmatpush3.bf16.msra.mxu1 %v2239_v16 }
  0xad   : > { %2030 = vmatprep.subr.bf16.mxu1 %v2408_v0 }
  0xae   : > { %2011 = vmatpush3.bf16.msra.mxu0 %v2226_v62 }
  0xaf   : > { %2036 = vmatprep.subr.bf16.mxu0 %v2408_v0 }
  0xb0   : > { %2031 = vmatpush3.bf16.msra.mxu1 %v2241_v19 }
  0xb1   : > { %2013 = vmatmul.mubr.bf16.vlgmr.msra.gmra.mrb[8].mxu0 %v789_v2  ;;  %2056 = vmatprep.subr.bf16.mxu1 %v2408_v0 }
  0xb2   : > { %2052 = vmatprep.mubr.msk.bf16.mxu0 %vm2409_vm0, %v2408_v0  ;;  %2037 = vmatpush3.bf16.msra.mxu0 %v2228_v4 }
  0xb3   : > { %2038 = vmatprep.subr.bf16.mxu0 %v2408_v0 }
  0xb6   : > { %2039 = vmatpush3.bf16.msra.mxu0 %v2230_v6 }
  0xb7   : > { %2040 = vmatprep.subr.bf16.mxu0 %v2408_v0 }
  0xba   : > { %2041 = vmatpush3.bf16.msra.mxu0 %v2232_v8 }
  0xbb   : > { %2042 = vmatprep.subr.bf16.mxu0 %v2408_v0 }
  0xbe   : > { %2043 = vmatpush3.bf16.msra.mxu0 %v2234_v10 }
  0xbf   : > { %2044 = vmatprep.subr.bf16.mxu0 %v2408_v0 }
  0xc2   : > { %2045 = vmatpush3.bf16.msra.mxu0 %v2236_v12 }
  0xc3   : > { %2046 = vmatprep.subr.bf16.mxu0 %v2408_v0 }
  0xc6   : > { %2047 = vmatpush3.bf16.msra.mxu0 %v2238_v14 }
  0xc7   : > { %2048 = vmatprep.subr.bf16.mxu0 %v2408_v0 }
  0xca   : > { %2049 = vmatpush3.bf16.msra.mxu0 %v2240_v17 }
  0xcb   : > { %2050 = vmatprep.subr.bf16.mxu0 %v2408_v0 }
  0xce   : > { %2051 = vmatpush3.bf16.msra.mxu0 %v2242_v20 }
  0xcf   : > { %2076 = vmatprep.subr.bf16.mxu0 %v2408_v0 }
  0xd7   : > { %v539_v15 = vpop.permute.xlu1 %538  ;;  %v413_v18 = vpop.permute.xlu0 %412 }
  0xdb   : > { %v544_v21 = vpop.permute.xlu1 %543  ;;  %v418_v23 = vpop.permute.xlu0 %417 }
  0xdf   : > { %v776_v37 = vpop.permute.xlu0 %775  ;;  %v781_v39 = vpop.permute.xlu1 %780 }
  0xe3   : > { %v902_v52 = vpop.permute.xlu0 %901  ;;  %v907_v56 = vpop.permute.xlu1 %906 }
 0x144   : > { %v401_v22 = vpop.f32.mrb[0].mxu0  ;;  %v526_v25 = vpop.f32.mrb[0].mxu1 }
 0x145   : > { %v420_v24 = vmul.f32 %v413_v18, %v401_v22  ;;  %v1934_v26 = vpop.f32.mrb[1].mxu0  ;;  %v546_v27 = vmul.f32 %v539_v15, %v526_v25  ;;  %v1954_v28 = vpop.f32.mrb[1].mxu1 }
 0x146   : > { %v404_v29 = vpop.f32.mrb[2].mxu0  ;;  %v529_v31 = vpop.f32.mrb[2].mxu1 }
 0x147   : > { %v421_v30 = vmul.f32 %v418_v23, %v404_v29  ;;  %v1935_v32 = vpop.f32.mrb[3].mxu0  ;;  %v547_v33 = vmul.f32 %v544_v21, %v529_v31  ;;  %v1955_v34 = vpop.f32.mrb[3].mxu1  ;;  %v548_v35 = vadd.f32 %v546_v27, %v420_v24 }
 0x149   : > { %v549_v36 = vadd.f32 %v547_v33, %v421_v30 }
 0x164   : > { %v652_v38 = vpop.f32.mrb[4].mxu0  ;;  %v763_v41 = vpop.f32.mrb[4].mxu1 }
 0x165   : > { %v659_v40 = vadd.f32 %v652_v38, %v548_v35  ;;  %v1974_v42 = vpop.f32.mrb[5].mxu0  ;;  %v783_v0 = vmul.f32 %v776_v37, %v763_v41  ;;  %v1994_v43 = vpop.f32.mrb[5].mxu1 }
 0x166   : > { %v655_v44 = vpop.f32.mrb[6].mxu0  ;;  %v766_v46 = vpop.f32.mrb[6].mxu1 }
 0x167   : > { %v660_v45 = vadd.f32 %v655_v44, %v549_v36  ;;  %v1975_v47 = vpop.f32.mrb[7].mxu0  ;;  %v785_v48 = vadd.f32 %v783_v0, %v659_v40  ;;  %v784_v49 = vmul.f32 %v781_v39, %v766_v46  ;;  %v1995_v50 = vpop.f32.mrb[7].mxu1  ;;  %v2411_v40 = vmov -1.0  }
 0x169   : > { %v786_v51 = vadd.f32 %v784_v49, %v660_v45 }
 0x184   : > { %v889_v53 = vpop.f32.mrb[8].mxu0 }
 0x185   : > { %v909_v54 = vmul.f32 %v902_v52, %v889_v53  ;;  %v2014_v55 = vpop.f32.mrb[9].mxu0 }
 0x186   : > { %v892_v58 = vpop.f32.mrb[10].mxu0  ;;  %v2244_v55 = vld [vmem:[#allocation7 + $0x340] sm:$0xff]  }
 0x187   : > { %v911_v59 = vadd.f32 %v909_v54, %v785_v48  ;;  %v910_v60 = vmul.f32 %v907_v56, %v892_v58  ;;  %v2015_v61 = vpop.f32.mrb[11].mxu0  ;;  %v2243_v54 = vld [vmem:[#allocation7 + $0x300] sm:$0xff]  }
 0x188   : > { %v2245_v61 = vld [vmem:[#allocation7 + $0x308] sm:$0xff]  }
 0x189   : > { %v920_v62 = vadd.f32 %v1767_v57, %v911_v59  ;;  %v912_v63 = vadd.f32 %v910_v60, %v786_v51 }
 0x18b   : > { %v922_v1 = vmul.f32 0.70710677, %v920_v62  ;;  %v921_v2 = vadd.f32 %v1767_v57, %v912_v63  ;;  %v970_v44 = vmul.f32 0.5, %v920_v62  ;;  %v2246_v62 = vld [vmem:[#allocation7 + $0x348] sm:$0xff]   ;;  %v2691_v63 = vld [vmem:[#allocation2] sm:$0xff] }
 0x18d   : > { %v928_v3 = vand.u32 2147483647, %v922_v1  ;;  %v923_v4 = vmul.f32 0.70710677, %v921_v2  ;;  %vm924_vm1 = vcmp.ge.f32.partialorder %v922_v1, 0.0  ;;  %v971_v49 = vmul.f32 0.5, %v921_v2 }
 0x18e   : > { %v926_v41 = vsel %vm924_vm1, 1.0, %v2411_v40  ;;  %v2247_v1 = vld [vmem:[#allocation7 + $0x310] sm:$0xff]  }
 0x18f   : > { %v930_v5 = vmul.f32 0.3275911, %v928_v3  ;;  %v929_v6 = vand.u32 2147483647, %v923_v4  ;;  %v956_v10 = vsub.f32 0.0, %v928_v3  ;;  %vm925_vm2 = vcmp.ge.f32.partialorder %v923_v4, 0.0 }
 0x190   : > { %v927_v46 = vsel %vm925_vm2, 1.0, %v2411_v40  ;;  %v2248_v2 = vld [vmem:[#allocation7 + $0x350] sm:$0xff]   ;;  %v2250_v4 = vld [vmem:[#allocation7 + $0x358] sm:$0xff]  }
 0x191   : > { %v932_v7 = vadd.f32 1.0, %v930_v5  ;;  %v931_v8 = vmul.f32 0.3275911, %v929_v6  ;;  %v957_v11 = vsub.f32 0.0, %v929_v6  ;;  %v958_v13 = vmul.f32 %v956_v10, %v928_v3  ;;  %v2249_v3 = vld [vmem:[#allocation7 + $0x318] sm:$0xff]   ;;  %v2251_v5 = vld [vmem:[#allocation7 + $0x320] sm:$0xff]  }
 0x192   : > { %v2256_v10 = vld [vmem:[#allocation7 + $0x370] sm:$0xff]  }
 0x193   : > { %2267 = vrcp.f32 %v932_v7  ;;  %v933_v9 = vadd.f32 1.0, %v931_v8  ;;  %v959_v17 = vmul.f32 %v957_v11, %v929_v6  ;;  %v960_v18 = vmul.f32 1.442695, %v958_v13  ;;  %v2252_v6 = vld [vmem:[#allocation7 + $0x360] sm:$0xff]   ;;  %v2253_v7 = vld [vmem:[#allocation7 + $0x328] sm:$0xff]   ;;  %v2257_v11 = vld [vmem:[#allocation7 + $0x338] sm:$0xff]  }
 0x194   : > { %v2254_v8 = vld [vmem:[#allocation7 + $0x368] sm:$0xff]  }
 0x195   : > { %2269 = vrcp.f32 %v933_v9  ;;  %v962_v23 = vmul.f32 1.442695, %v959_v17  ;;  %v2255_v9 = vld [vmem:[#allocation7 + $0x330] sm:$0xff]   ;;  %v2260_v17 = vld [vmem:[#allocation7 + $0x388] sm:$0xff]  }
 0x196   : > { %2271 = vpow2.f32 %v960_v18  ;;  %v2261_v18 = vld [vmem:[#allocation7 + $0x390] sm:$0xff]  }
 0x197   : > { %2273 = vpow2.f32 %v962_v23  ;;  %v2266_v23 = vld [vmem:[#allocation7 + $0x3b8] sm:$0xff]  }
 0x19d   : > { %v2268_v12 = vpop.eup %2267 }
 0x19e   : > { %v938_v14 = vmul.f32 1.0614054, %v2268_v12 }
 0x19f   : > { %v2270_v15 = vpop.eup %2269 }
 0x1a0   : > { %v940_v16 = vadd.f32 -1.4531521, %v938_v14  ;;  %v939_v19 = vmul.f32 1.0614054, %v2270_v15  ;;  %v2272_v34 = vpop.eup %2271 }
 0x1a1   : > { %v2274_v38 = vpop.eup %2273 }
 0x1a2   : > { %v942_v20 = vmul.f32 %v2268_v12, %v940_v16  ;;  %v941_v21 = vadd.f32 -1.4531521, %v939_v19  ;;  %v2262_v19 = vld [vmem:[#allocation7 + $0x398] sm:$0xff]  }
 0x1a4   : > { %v944_v22 = vadd.f32 1.4214138, %v942_v20  ;;  %v943_v24 = vmul.f32 %v2270_v15, %v941_v21  ;;  %v2263_v20 = vld [vmem:[#allocation7 + $0x3a0] sm:$0xff]   ;;  %v2264_v21 = vld [vmem:[#allocation7 + $0x3a8] sm:$0xff]  }
 0x1a6   : > { %v946_v25 = vmul.f32 %v2268_v12, %v944_v22  ;;  %v945_v26 = vadd.f32 1.4214138, %v943_v24  ;;  %v2265_v22 = vld [vmem:[#allocation7 + $0x3b0] sm:$0xff]  }
 0x1a8   : > { %v948_v27 = vadd.f32 -0.28449672, %v946_v25  ;;  %v947_v28 = vmul.f32 %v2270_v15, %v945_v26 }
 0x1aa   : > { %v950_v29 = vmul.f32 %v2268_v12, %v948_v27  ;;  %v949_v30 = vadd.f32 -0.28449672, %v947_v28  ;;  %v1109_v27 = vpop.permute.xlu1 %1108  ;;  %v1104_v28 = vpop.permute.xlu0 %1103 }
 0x1ac   : > { %v952_v31 = vadd.f32 0.2548296, %v950_v29  ;;  %v951_v32 = vmul.f32 %v2270_v15, %v949_v30 }
 0x1ae   : > { %v954_v33 = vmul.f32 %v2268_v12, %v952_v31  ;;  %v953_v35 = vadd.f32 0.2548296, %v951_v32  ;;  %v2258_v12 = vld [vmem:[#allocation7 + $0x378] sm:$0xff]   ;;  %v1234_v29 = vpop.permute.xlu1 %1233  ;;  %v1229_v30 = vpop.permute.xlu0 %1228 }
 0x1b0   : > { %v964_v36 = vmul.f32 %v2272_v34, %v954_v33  ;;  %v955_v37 = vmul.f32 %v2270_v15, %v953_v35  ;;  %v2259_v15 = vld [vmem:[#allocation7 + $0x380] sm:$0xff]  }
 0x1b2   : > { %v966_v39 = vsub.f32 1.0, %v964_v36  ;;  %v965_v42 = vmul.f32 %v2274_v38, %v955_v37 }
 0x1b4   : > { %v968_v0 = vmul.f32 %v966_v39, %v926_v41  ;;  %v967_v43 = vsub.f32 1.0, %v965_v42 }
 0x1b6   : > { %v972_v45 = vadd.f32 1.0, %v968_v0  ;;  %v969_v47 = vmul.f32 %v967_v43, %v927_v46 }
 0x1b8   : > { %v2683_v48 = vmul.f32 %v972_v45, %v970_v44  ;;  %v973_v50 = vadd.f32 1.0, %v969_v47  ;;  %v1470_v44 = vpop.permute.xlu1 %1469  ;;  %v1465_v45 = vpop.permute.xlu0 %1464 }
 0x1ba   : > { %988 = vst [vmem:[#allocation3 + $0x28] sm:$0xff] %v2683_v48  ;;  %v2686_v51 = vmul.f32 %v973_v50, %v971_v49 }
 0x1bc   : > { %989 = vst [vmem:[#allocation3 + $0x30] sm:$0xff] %v2686_v51  ;;  %v1242_v52 = vpack.c.bf16 %v2686_v51, %v2683_v48 }
 0x1c1   : > { %v990_v53 = vld [vmem:[#allocation3 + $0x26] sm:$0xff] }
 0x1c2   : > { %v1115_v57 = vld [vmem:[#allocation3 + $0x27] sm:$0xff] }
 0x1c3   : > { %v991_v56 = vld [vmem:[#allocation3 + $0x2e] sm:$0xff] }
 0x1c4   : > { %v1116_v58 = vld [vmem:[#allocation3 + $0x2f] sm:$0xff]  ;;  %v992_v59 = vpack.c.bf16 %v991_v56, %v990_v53 }
 0x1c5   : > { %v1117_v60 = vpack.c.bf16 %v1116_v58, %v1115_v57  ;;  %v1351_v13 = vld [vmem:[#allocation3 + $0x29] sm:$0xff]  ;;  %v1352_v14 = vld [vmem:[#allocation3 + $0x31] sm:$0xff] }
 0x1c6   : > { %2033 = vmatmul.mubr.bf16.vlgmr.msra.gmra.mrb[8].mxu1 %v992_v59  ;;  %v1353_v16 = vpack.c.bf16 %v1352_v14, %v1351_v13  ;;  %v1476_v24 = vld [vmem:[#allocation3 + $0x2a] sm:$0xff]  ;;  %v1477_v25 = vld [vmem:[#allocation3 + $0x32] sm:$0xff] }
 0x1c7   : > { %2053 = vmatmul.mubr.bf16.vlgmr.msra.gmra.mrb[12].mxu0 %v1117_v60  ;;  %2057 = vmatpush3.bf16.msra.mxu1 %v2243_v54  ;;  %v1478_v26 = vpack.c.bf16 %v1477_v25, %v1476_v24  ;;  %v1590_v60 = vpop.permute.xlu0 %1589 }
 0x1c8   : > { %2077 = vmatpush3.bf16.msra.mxu0 %v2244_v55  ;;  %2058 = vmatprep.subr.bf16.mxu1 %v2691_v63 }
 0x1c9   : > { %2078 = vmatprep.subr.bf16.mxu0 %v2691_v63  ;;  %2072 = vmatprep.mubr.msk.bf16.mxu1 %vm2409_vm0, %v2691_v63 }
 0x1ca   : > { %2092 = vmatprep.mubr.msk.bf16.mxu0 %vm2409_vm0, %v2691_v63 }
 0x1cb   : > { %2059 = vmatpush3.bf16.msra.mxu1 %v2245_v61 }
 0x1cc   : > { %2079 = vmatpush3.bf16.msra.mxu0 %v2246_v62  ;;  %2060 = vmatprep.subr.bf16.mxu1 %v2691_v63 }
 0x1cd   : > { %2080 = vmatprep.subr.bf16.mxu0 %v2691_v63 }
 0x1cf   : > { %2061 = vmatpush3.bf16.msra.mxu1 %v2247_v1  ;;  %v1595_v1 = vpop.permute.xlu1 %1594 }
 0x1d0   : > { %2081 = vmatpush3.bf16.msra.mxu0 %v2248_v2  ;;  %2062 = vmatprep.subr.bf16.mxu1 %v2691_v63  ;;  %v1814_v2 = vld [vmem:[%s2779_s5] ss:$0 sm:$0xff] }
 0x1d1   : > { %2082 = vmatprep.subr.bf16.mxu0 %v2691_v63 }
 0x1d3   : > { %2063 = vmatpush3.bf16.msra.mxu1 %v2249_v3 }
 0x1d4   : > { %2083 = vmatpush3.bf16.msra.mxu0 %v2250_v4  ;;  %2064 = vmatprep.subr.bf16.mxu1 %v2691_v63 }
 0x1d5   : > { %2084 = vmatprep.subr.bf16.mxu0 %v2691_v63 }
 0x1d7   : > { %2065 = vmatpush3.bf16.msra.mxu1 %v2251_v5 }
 0x1d8   : > { %2085 = vmatpush3.bf16.msra.mxu0 %v2252_v6  ;;  %2066 = vmatprep.subr.bf16.mxu1 %v2691_v63 }
 0x1d9   : > { %2086 = vmatprep.subr.bf16.mxu0 %v2691_v63 }
 0x1db   : > { %2067 = vmatpush3.bf16.msra.mxu1 %v2253_v7 }
 0x1dc   : > { %2087 = vmatpush3.bf16.msra.mxu0 %v2254_v8  ;;  %2068 = vmatprep.subr.bf16.mxu1 %v2691_v63 }
 0x1dd   : > { %2088 = vmatprep.subr.bf16.mxu0 %v2691_v63 }
 0x1df   : > { %2069 = vmatpush3.bf16.msra.mxu1 %v2255_v9 }
 0x1e0   : > { %2089 = vmatpush3.bf16.msra.mxu0 %v2256_v10  ;;  %2070 = vmatprep.subr.bf16.mxu1 %v2691_v63 }
 0x1e1   : > { %2090 = vmatprep.subr.bf16.mxu0 %v2691_v63 }
 0x1e3   : > { %2071 = vmatpush3.bf16.msra.mxu1 %v2257_v11 }
 0x1e4   : > { %2091 = vmatpush3.bf16.msra.mxu0 %v2258_v12  ;;  %2096 = vmatprep.subr.bf16.mxu1 %v2691_v63 }
 0x1e6   : > { %2073 = vmatmul.mubr.bf16.vlgmr.msra.gmra.mrb[12].mxu1 %v1242_v52 }
 0x1e7   : > { %2093 = vmatmul.mubr.bf16.vlgmr.msra.gmra.mrb[16].mxu0 %v1353_v16  ;;  %2097 = vmatpush3.bf16.msra.mxu1 %v2259_v15 }
 0x1e8   : > { %2112 = vmatprep.mubr.msk.bf16.mxu1 %vm2409_vm0, %v2691_v63  ;;  %2098 = vmatprep.subr.bf16.mxu1 %v2691_v63 }
 0x1eb   : > { %2099 = vmatpush3.bf16.msra.mxu1 %v2260_v17 }
 0x1ec   : > { %2100 = vmatprep.subr.bf16.mxu1 %v2691_v63 }
 0x1ef   : > { %2101 = vmatpush3.bf16.msra.mxu1 %v2261_v18 }
 0x1f0   : > { %2102 = vmatprep.subr.bf16.mxu1 %v2691_v63 }
 0x1f3   : > { %2103 = vmatpush3.bf16.msra.mxu1 %v2262_v19 }
 0x1f4   : > { %2104 = vmatprep.subr.bf16.mxu1 %v2691_v63 }
 0x1f7   : > { %2105 = vmatpush3.bf16.msra.mxu1 %v2263_v20 }
 0x1f8   : > { %2106 = vmatprep.subr.bf16.mxu1 %v2691_v63 }
 0x1fb   : > { %2107 = vmatpush3.bf16.msra.mxu1 %v2264_v21 }
 0x1fc   : > { %2108 = vmatprep.subr.bf16.mxu1 %v2691_v63 }
 0x1ff   : > { %2109 = vmatpush3.bf16.msra.mxu1 %v2265_v22 }
 0x200   : > { %2110 = vmatprep.subr.bf16.mxu1 %v2691_v63 }
 0x203   : > { %2111 = vmatpush3.bf16.msra.mxu1 %v2266_v23 }
 0x206   : > { %2113 = vmatmul.mubr.bf16.vlgmr.msra.gmra.mrb[16].mxu1 %v1478_v26 }
 0x299   : > { %v1092_v31 = vpop.f32.mrb[8].mxu1 }
 0x29a   : > { %v1217_v32 = vpop.f32.mrb[12].mxu0  ;;  %v1111_v33 = vmul.f32 %v1104_v28, %v1092_v31  ;;  %v2034_v35 = vpop.f32.mrb[9].mxu1 }
 0x29b   : > { %v1236_v34 = vmul.f32 %v1229_v30, %v1217_v32  ;;  %v2054_v36 = vpop.f32.mrb[13].mxu0  ;;  %v1095_v37 = vpop.f32.mrb[10].mxu1 }
 0x29c   : > { %v1220_v38 = vpop.f32.mrb[14].mxu0  ;;  %v1112_v39 = vmul.f32 %v1109_v27, %v1095_v37  ;;  %v2035_v41 = vpop.f32.mrb[11].mxu1 }
 0x29d   : > { %v1237_v40 = vmul.f32 %v1234_v29, %v1220_v38  ;;  %v2055_v42 = vpop.f32.mrb[15].mxu0  ;;  %v1238_v0 = vadd.f32 %v1236_v34, %v1111_v33 }
 0x29f   : > { %v1239_v43 = vadd.f32 %v1237_v40, %v1112_v39 }
 0x2b9   : > { %v1342_v46 = vpop.f32.mrb[12].mxu1 }
 0x2ba   : > { %v1453_v47 = vpop.f32.mrb[16].mxu0  ;;  %v1349_v48 = vadd.f32 %v1342_v46, %v1238_v0  ;;  %v2074_v50 = vpop.f32.mrb[13].mxu1 }
 0x2bb   : > { %v1472_v49 = vmul.f32 %v1465_v45, %v1453_v47  ;;  %v2094_v51 = vpop.f32.mrb[17].mxu0  ;;  %v1345_v52 = vpop.f32.mrb[14].mxu1 }
 0x2bc   : > { %v1456_v53 = vpop.f32.mrb[18].mxu0  ;;  %v1350_v55 = vadd.f32 %v1345_v52, %v1239_v43  ;;  %v2075_v57 = vpop.f32.mrb[15].mxu1 }
 0x2bd   : > { %v1474_v54 = vadd.f32 %v1472_v49, %v1349_v48  ;;  %v1473_v56 = vmul.f32 %v1470_v44, %v1456_v53  ;;  %v2095_v58 = vpop.f32.mrb[19].mxu0 }
 0x2bf   : > { %v1475_v59 = vadd.f32 %v1473_v56, %v1350_v55 }
 0x2d9   : > { %v1578_v61 = vpop.f32.mrb[16].mxu1 }
 0x2da   : > { %v1597_v62 = vmul.f32 %v1590_v60, %v1578_v61  ;;  %v2114_v63 = vpop.f32.mrb[17].mxu1 }
 0x2db   : > { %v1581_v3 = vpop.f32.mrb[18].mxu1 }
 0x2dc   : > { %v1599_v4 = vadd.f32 %v1597_v62, %v1474_v54  ;;  %v1598_v5 = vmul.f32 %v1595_v1, %v1581_v3  ;;  %v2115_v6 = vpop.f32.mrb[19].mxu1 }
 0x2de   : > { %v1608_v7 = vadd.f32 %v1814_v2, %v1599_v4  ;;  %v1600_v8 = vadd.f32 %v1598_v5, %v1475_v59 }
 0x2e0   : > { %1610 = vst [vmem:[%s274_s11] sm:$0xff] %v1608_v7  ;;  %v1609_v9 = vadd.f32 %v1814_v2, %v1600_v8 }
 0x2e2   : > { %1611 = vst [vmem:[%s274_s11 + $0x8] sm:$0xff] %v1609_v9 }
 0x2e3   : > { %2345 = shalt.err (!%p2342_p11)
}
 0x2e4   : > { %s2346_s18 = scalar_lea.hbm %s2731_s14, 256  ;;  %s2350_s26 = scalar_lea.hbm %s2780_s6, 512 }
 0x2e5   : > { %p2347_p13 = scmp.ne.s32.totalorder %s2731_s14, %s2346_s18  ;;  %p2351_p6 = scmp.lt.u32.totalorder %s2731_s14, %s2780_s6 }
 0x2e6   : > { %p2352_p9 = scmp.lt.u32.totalorder %s2350_s26, %s2346_s18  ;;  %p2354_p10 = scmp.lt.u32.totalorder %s2346_s18, %s2731_s14 }
 0x2e7   : > { %p2348_p5 = pnand %p2347_p13, %p2793_p1 }
 0x2e8   : > { %p2353_p12 = por %p2352_p9, %p2351_p6 }
 0x2e9   : > { %p2349_p0 = pneg %p2348_p5 }
 0x2ea   : > { %p2355_p2 = por %p2354_p10, %p2353_p12 }
 0x2ec   : > { %p2356_p3 = pnand %p2355_p2, %p2349_p0 }
 0x2ee   : > { %2359 = shalt.err (!%p2356_p3)
}
 0x2ef   : > { %s2413_s15 = smov 128   ;;  %s2414_s9 = smov 8  }
 0x2f0   : > { %2124 = dma.vmem_to_hbm [thread:$0]  (%p2793_p1), %s2726_s13, 256, %s2731_s14, %s2733_s29, %s2413_s15, %s2413_s15, %s2414_s9  }
 0x2f1 PF: > { %p2141_p4 = scmp.ge.s32.totalorder %s2402_s24, 2  ;;  %s1641_s12 = sand.u32 1, %s2390_s21  }
 0x2f2   : > { %p2794_p7 = scmp.ne.s32.totalorder %s2785_s8, 0  ;;  %s1642_s16 = scalar_lea.sflag [#allocation6], %s1641_s12 }
 0x2f4   : > { %p2134_p8 = pnand %p2141_p4, %p2794_p7 }
 0x2f6   : > { %2385 = dma.done.wait (!%p2134_p8), %s1642_s16, 256  }
 0x2f7   : > { %2387 = vsyncadd (!%p2134_p8), %s1642_s16, 4294967040  ;;  %p18_p11 = scmp.ge.s32.totalorder %s2475_s27, 4   ;;  %s2795_s21 = smov %s2394_s22 }
 0x2f8   : > { %s2796_s22 = smov %s2398_s23  ;;  %s2797_s23 = smov %s2486_s30 }
 0x2f9   : > { %s2798_s24 = smov %s2475_s27  ;;  %20 = sbr.rel (!%p18_p11) target bundleno = 5 (0x5), region = 101 }
 0x300   :  { %1647 = vsyncpa [#allocation5], 1 }
 0x301   :  { %1649 = vsyncpa [#allocation5 + $0x1], 1 }
 0x302   :  { %1650 = vsyncpa [#allocation8], 1 }
 0x303   :  { %1651 = vsyncpa [#allocation6], 1 }
 0x304   :  { %1653 = vsyncpa [#allocation6 + $0x1], 1 }

</bundles_post_ra>
